<compile_context>
chip_gen: v7x
topology: tpu7x:2x2x1
jax: 0.10.0
libtpu: 0.0.40
codegen_flags: <defaults>
</compile_context>

<pallas_src>
import functools

import jax
import jax.numpy as jnp
from jax.experimental import pallas as pl
from jax.experimental.pallas import tpu as pltpu

LANE = 128


def _pad_axis(x, axis, mult):
    pad = (-x.shape[axis]) % mult
    if pad == 0:
        return x
    widths = [(0, 0)] * x.ndim
    widths[axis] = (0, pad)
    return jnp.pad(x, widths)


def biresnet_kernel(v_ref, q_ref, att_ref, wv_ref, bv_ref, wq_ref, bq_ref,
                    wp_ref, bp_ref, o_ref, *, glimpse):
    # Per-grid-step tile covers TB batch elements; weights are fully resident.
    TB, V, Dv = v_ref.shape
    _, Q, H = q_ref.shape           # H is the lane-padded hidden dim
    bf16 = jnp.bfloat16

    # ---- hoisted, glimpse-fused v_net: one (TB*V, Dv) x (Dv, G*H) matmul ----
    vflat = v_ref[...].reshape(TB * V, Dv).astype(bf16)
    vp_all = jnp.maximum(
        jnp.dot(vflat, wv_ref[...], preferred_element_type=jnp.float32)
        + bv_ref[...], 0.0)                                      # (TB*V, G*H) f32

    att_all = att_ref[...]                                       # (TB, G, V, Q) f32
    q = q_ref[...].astype(jnp.float32)                           # (TB, Q, H) f32 carry

    for g in range(glimpse):        # static unroll; q feeds back -> sequential
        # q_net: ReLU(weight-normed Linear); dropout = identity (eval mode)
        qflat = q.reshape(TB * Q, H).astype(bf16)
        qp = jnp.maximum(
            jnp.dot(qflat, wq_ref[g], preferred_element_type=jnp.float32)
            + bq_ref[pl.ds(g, 1), :], 0.0)                       # (TB*Q, H) f32
        qp3 = qp.reshape(TB, Q, H)
        # lane-aligned slice of the fused v_net output for this glimpse
        vp3 = vp_all[:, g * H:(g + 1) * H].reshape(TB, V, H)     # (TB, V, H)
        att_g = att_all[:, g]                                    # (TB, V, Q)
        # bilinear attention pooling: b_emb[b,d] = sum_ij vp*att*qp (batched)
        tmp = jnp.einsum('bvq,bqh->bvh', att_g.astype(bf16), qp3.astype(bf16),
                         preferred_element_type=jnp.float32)     # (TB, V, H)
        b_emb = jnp.sum(vp3 * tmp, axis=1)                       # (TB, H)
        # q_prj: weight-normed Linear (no activation) + broadcast residual
        proj = (jnp.dot(b_emb.astype(bf16), wp_ref[g],
                        preferred_element_type=jnp.float32)
                + bp_ref[pl.ds(g, 1), :])                        # (TB, H)
        q = q + proj[:, None, :]

    # One contiguous, lane-dense (TB, H) slab per grid step.
    o_ref[...] = jnp.sum(q, axis=1)


def biresnet_forward(v_emb, q_emb, att, wv, bv, wq, bq, wp, bp, *, block_b=8):
    B, V, Dv = v_emb.shape
    _, Q, H = q_emb.shape
    G = att.shape[1]

    # ---- host-side lane padding (exact; see header comment) ----
    v_p = _pad_axis(v_emb, -1, LANE)                             # (B, V, Dvp)
    q_p = _pad_axis(q_emb, -1, LANE)                             # (B, Q, Hp)
    Dvp, Hp = v_p.shape[-1], q_p.shape[-1]

    wv_p = _pad_axis(_pad_axis(wv, 1, LANE), 2, LANE)            # (G, Dvp, Hp)
    wq_p = _pad_axis(_pad_axis(wq, 1, LANE), 2, LANE)            # (G, Hp, Hp)
    wp_p = _pad_axis(_pad_axis(wp, 1, LANE), 2, LANE)            # (G, Hp, Hp)
    bv_p = _pad_axis(bv, -1, LANE)                               # (G, Hp)
    bq_p = _pad_axis(bq, -1, LANE).astype(jnp.float32)
    bp_p = _pad_axis(bp, -1, LANE).astype(jnp.float32)

    # Glimpse-fused v_net weight (Dvp, G*Hp); weights bf16 at the boundary.
    wv_fused = jnp.transpose(wv_p, (1, 0, 2)).reshape(Dvp, G * Hp).astype(jnp.bfloat16)
    bv_fused = bv_p.reshape(1, G * Hp).astype(jnp.float32)
    wq_b = wq_p.astype(jnp.bfloat16)
    wp_b = wp_p.astype(jnp.bfloat16)

    TB = block_b if (B % block_b == 0 and block_b <= B) else B
    n_tiles = pl.cdiv(B, TB)

    out_padded = pl.pallas_call(
        functools.partial(biresnet_kernel, glimpse=G),
        out_shape=jax.ShapeDtypeStruct((B, Hp), jnp.float32),
        grid=(n_tiles,),
        in_specs=[
            pl.BlockSpec((TB, V, Dvp), lambda b: (b, 0, 0)),       # v_emb (batch tile)
            pl.BlockSpec((TB, Q, Hp), lambda b: (b, 0, 0)),        # q_emb
            pl.BlockSpec((TB, G, V, Q), lambda b: (b, 0, 0, 0)),   # att_p
            pl.BlockSpec((Dvp, G * Hp), lambda b: (0, 0)),         # Wv fused (bf16)
            pl.BlockSpec((1, G * Hp), lambda b: (0, 0)),           # bv fused
            pl.BlockSpec((G, Hp, Hp), lambda b: (0, 0, 0)),        # Wq (bf16)
            pl.BlockSpec((G, Hp), lambda b: (0, 0)),               # bq
            pl.BlockSpec((G, Hp, Hp), lambda b: (0, 0, 0)),        # Wp (bf16)
            pl.BlockSpec((G, Hp), lambda b: (0, 0)),               # bp
        ],
        out_specs=pl.BlockSpec((TB, Hp), lambda b: (b, 0)),        # lane-dense output
        compiler_params=pltpu.CompilerParams(
            dimension_semantics=("parallel",)),                    # batch tiles -> both v7x TCs
    )(v_p, q_p, att, wv_fused, bv_fused, wq_b, bq_p, wp_b, bp_p)

    return out_padded[:, :H]


def biresnet_ref(v_emb, q_emb, att, wv, bv, wq, bq, wp, bp):
    """Pure-JAX f32 reference matching the PyTorch forward (eval mode)."""
    q = q_emb
    G = att.shape[1]
    for g in range(G):
        vp = jax.nn.relu(v_emb @ wv[g] + bv[g])                    # (B, V, H)
        qp = jax.nn.relu(q @ wq[g] + bq[g])                        # (B, Q, H)
        tmp = jnp.einsum('bvq,bqh->bvh', att[:, g], qp)            # (B, V, H)
        b_emb = jnp.sum(vp * tmp, axis=1)                          # (B, H)
        proj = b_emb @ wp[g] + bp[g]                               # (B, H)
        q = q + proj[:, None, :]
    return q.sum(axis=1)


def biresnet_ref_bf16(v_emb, q_emb, att, wv, bv, wq, bq, wp, bp):
    """Reference that mirrors the kernel's bf16-input / f32-accumulate matmuls."""
    bf = jnp.bfloat16
    q = q_emb.astype(jnp.float32)
    G = att.shape[1]
    for g in range(G):
        vp = jax.nn.relu(
            jnp.dot(v_emb.astype(bf).reshape(-1, v_emb.shape[-1]),
                    wv[g].astype(bf), preferred_element_type=jnp.float32)
            .reshape(v_emb.shape[0], v_emb.shape[1], -1) + bv[g])
        qp = jax.nn.relu(
            jnp.dot(q.astype(bf).reshape(-1, q.shape[-1]),
                    wq[g].astype(bf), preferred_element_type=jnp.float32)
            .reshape(q.shape[0], q.shape[1], -1) + bq[g])
        tmp = jnp.einsum('bvq,bqh->bvh', att[:, g].astype(bf), qp.astype(bf),
                         preferred_element_type=jnp.float32)
        b_emb = jnp.sum(vp * tmp, axis=1)
        proj = jnp.dot(b_emb.astype(bf), wp[g].astype(bf),
                       preferred_element_type=jnp.float32) + bp[g]
        q = q + proj[:, None, :]
    return q.sum(axis=1)


def make_weightnorm_linear(key, in_dim, out_dim):
    """PyTorch weight_norm(nn.Linear(in,out), dim=None): W = g * V / ||V||_F."""
    kv, kg, kb = jax.random.split(key, 3)
    v = jax.random.normal(kv, (out_dim, in_dim), jnp.float32) / jnp.sqrt(in_dim)
    g = jax.random.uniform(kg, (), jnp.float32, 0.5, 1.5)
    w = g * v / jnp.linalg.norm(v)
    b = jax.random.normal(kb, (out_dim,), jnp.float32) * 0.1
    return w.T, b  # (in, out) layout so the kernel computes x @ W


if __name__ == "__main__":
    # Small shapes consistent with the module: args.glimpse=2, dataset.v_dim=32,
    # args.hid_dim=32, 16 image regions, 8 question tokens; batch 16 so the
    # batch-tiled grid has 2 parallel tiles of TB=8.
    B, G, V, Q, V_DIM, HID = 16, 2, 16, 8, 32, 32

    key = jax.random.PRNGKey(0)
    k_in, k_par = jax.random.split(key)
    kv_, kq_, ka_ = jax.random.split(k_in, 3)
    v_emb = jax.random.normal(kv_, (B, V, V_DIM), jnp.float32)
    q_emb = jax.random.normal(kq_, (B, Q, HID), jnp.float32)
    att_p = jax.nn.softmax(
        jax.random.normal(ka_, (B, G, V, Q), jnp.float32), axis=-1)

    wv_l, bv_l, wq_l, bq_l, wp_l, bp_l = [], [], [], [], [], []
    pkeys = jax.random.split(k_par, G)
    for g in range(G):
        k1, k2, k3 = jax.random.split(pkeys[g], 3)
        w, b = make_weightnorm_linear(k1, V_DIM, HID); wv_l.append(w); bv_l.append(b)
        w, b = make_weightnorm_linear(k2, HID, HID);   wq_l.append(w); bq_l.append(b)
        w, b = make_weightnorm_linear(k3, HID, HID);   wp_l.append(w); bp_l.append(b)
    wv = jnp.stack(wv_l); bv = jnp.stack(bv_l)
    wq = jnp.stack(wq_l); bq = jnp.stack(bq_l)
    wp = jnp.stack(wp_l); bp = jnp.stack(bp_l)

    fwd = jax.jit(biresnet_forward)
    out = fwd(v_emb, q_emb, att_p, wv, bv, wq, bq, wp, bp)
    out = jax.block_until_ready(out)
    assert out.shape == (B, HID), out.shape

    # Tight check vs a reference with identical bf16-input / f32-accumulate math.
    ref_bf16 = biresnet_ref_bf16(v_emb, q_emb, att_p, wv, bv, wq, bq, wp, bp)
    assert jnp.allclose(out, ref_bf16, rtol=1e-3, atol=1e-3), (
        f"max abs err vs bf16 ref = {jnp.max(jnp.abs(out - ref_bf16))}")

    # Sanity check vs the pure-f32 reference (bf16 MXU inputs -> looser bound).
    ref_f32 = biresnet_ref(v_emb, q_emb, att_p, wv, bv, wq, bq, wp, bp)
    assert jnp.allclose(out, ref_f32, rtol=5e-2, atol=5e-2), (
        f"max abs err vs f32 ref = {jnp.max(jnp.abs(out - ref_f32))}")

    print("KERNEL_OK")
</pallas_src>

<mosaic_0001>
module attributes {stable_mosaic.version = 11 : i64} {
  func.func @biresnet_kernel(%arg0: i32, %arg1: memref<8x16x128xf32, #tpu.memory_space<vmem>>, %arg2: memref<8x8x128xf32, #tpu.memory_space<vmem>>, %arg3: memref<8x2x16x8xf32, #tpu.memory_space<vmem>>, %arg4: memref<128x256xbf16, #tpu.memory_space<vmem>>, %arg5: memref<1x256xf32, #tpu.memory_space<vmem>>, %arg6: memref<2x128x128xbf16, #tpu.memory_space<vmem>>, %arg7: memref<2x128xf32, #tpu.memory_space<vmem>>, %arg8: memref<2x128x128xbf16, #tpu.memory_space<vmem>>, %arg9: memref<2x128xf32, #tpu.memory_space<vmem>>, %arg10: memref<8x128xf32, #tpu.memory_space<vmem>>) attributes {dimension_semantics = [#tpu.dimension_semantics<parallel>], iteration_bounds = array<i64: 2>, scalar_prefetch = 0 : i64, scratch_operands = 0 : i64, tpu.core_type = #tpu.core_type<tc>, window_params = [{transform_indices = @transform_0, window_bounds = array<i64: 8, 16, 128>}, {transform_indices = @transform_1, window_bounds = array<i64: 8, 8, 128>}, {transform_indices = @transform_2, window_bounds = array<i64: 8, 2, 16, 8>}, {pipeline_mode = #tpu.pipeline_mode<synchronous>, transform_indices = @transform_3, window_bounds = array<i64: 128, 256>}, {pipeline_mode = #tpu.pipeline_mode<synchronous>, transform_indices = @transform_4, window_bounds = array<i64: 1, 256>}, {pipeline_mode = #tpu.pipeline_mode<synchronous>, transform_indices = @transform_5, window_bounds = array<i64: 2, 128, 128>}, {pipeline_mode = #tpu.pipeline_mode<synchronous>, transform_indices = @transform_6, window_bounds = array<i64: 2, 128>}, {pipeline_mode = #tpu.pipeline_mode<synchronous>, transform_indices = @transform_7, window_bounds = array<i64: 2, 128, 128>}, {pipeline_mode = #tpu.pipeline_mode<synchronous>, transform_indices = @transform_8, window_bounds = array<i64: 2, 128>}, {transform_indices = @transform_9, window_bounds = array<i64: 8, 128>}]} {
    %c0 = arith.constant 0 : index
    %c0_0 = arith.constant 0 : index
    %c0_1 = arith.constant 0 : index
    %0 = vector.load %arg1[%c0, %c0_0, %c0_1] : memref<8x16x128xf32, #tpu.memory_space<vmem>>, vector<8x16x128xf32>
    %1 = vector.shape_cast %0 : vector<8x16x128xf32> to vector<128x128xf32>
    %2 = arith.truncf %1 : vector<128x128xf32> to vector<128x128xbf16>
    %c0_2 = arith.constant 0 : index
    %c0_3 = arith.constant 0 : index
    %3 = vector.load %arg4[%c0_2, %c0_3] : memref<128x256xbf16, #tpu.memory_space<vmem>>, vector<128x256xbf16>
    %cst = arith.constant dense<0.000000e+00> : vector<128x256xf32>
    %4 = tpu.matmul %2, %3, %cst {dimension_numbers = #tpu.dot_dimension_numbers<[1], [0], [0], [1], [0, 0, 1, 1], [], []>} : vector<128x128xbf16>, vector<128x256xbf16>, vector<128x256xf32> -> vector<128x256xf32>
    %c0_4 = arith.constant 0 : index
    %c0_5 = arith.constant 0 : index
    %5 = vector.load %arg5[%c0_4, %c0_5] : memref<1x256xf32, #tpu.memory_space<vmem>>, vector<1x256xf32>
    %6 = vector.broadcast %5 : vector<1x256xf32> to vector<128x256xf32>
    %7 = arith.addf %4, %6 : vector<128x256xf32>
    %cst_6 = arith.constant 0.000000e+00 : f32
    %8 = vector.broadcast %cst_6 : f32 to vector<128x256xf32>
    %9 = arith.maximumf %7, %8 : vector<128x256xf32>
    %c0_7 = arith.constant 0 : index
    %c0_8 = arith.constant 0 : index
    %c0_9 = arith.constant 0 : index
    %c0_10 = arith.constant 0 : index
    %10 = vector.load %arg3[%c0_7, %c0_8, %c0_9, %c0_10] : memref<8x2x16x8xf32, #tpu.memory_space<vmem>>, vector<8x2x16x8xf32>
    %c0_11 = arith.constant 0 : index
    %c0_12 = arith.constant 0 : index
    %c0_13 = arith.constant 0 : index
    %11 = vector.load %arg2[%c0_11, %c0_12, %c0_13] : memref<8x8x128xf32, #tpu.memory_space<vmem>>, vector<8x8x128xf32>
    %12 = vector.shape_cast %11 : vector<8x8x128xf32> to vector<64x128xf32>
    %13 = arith.truncf %12 : vector<64x128xf32> to vector<64x128xbf16>
    %c0_14 = arith.constant 0 : index
    %c0_15 = arith.constant 0 : index
    %c0_16 = arith.constant 0 : index
    %14 = vector.load %arg6[%c0_14, %c0_15, %c0_16] : memref<2x128x128xbf16, #tpu.memory_space<vmem>>, vector<1x128x128xbf16>
    %15 = vector.shape_cast %14 : vector<1x128x128xbf16> to vector<128x128xbf16>
    %cst_17 = arith.constant dense<0.000000e+00> : vector<64x128xf32>
    %16 = tpu.matmul %13, %15, %cst_17 {dimension_numbers = #tpu.dot_dimension_numbers<[1], [0], [0], [1], [0, 0, 1, 1], [], []>} : vector<64x128xbf16>, vector<128x128xbf16>, vector<64x128xf32> -> vector<64x128xf32>
    %c0_18 = arith.constant 0 : index
    %c0_19 = arith.constant 0 : index
    %17 = vector.load %arg7[%c0_18, %c0_19] : memref<2x128xf32, #tpu.memory_space<vmem>>, vector<1x128xf32>
    %18 = vector.broadcast %17 : vector<1x128xf32> to vector<64x128xf32>
    %19 = arith.addf %16, %18 : vector<64x128xf32>
    %cst_20 = arith.constant 0.000000e+00 : f32
    %20 = vector.broadcast %cst_20 : f32 to vector<64x128xf32>
    %21 = arith.maximumf %19, %20 : vector<64x128xf32>
    %22 = vector.shape_cast %21 : vector<64x128xf32> to vector<8x8x128xf32>
    %23 = vector.extract_strided_slice %9 {offsets = [0, 0], sizes = [128, 128], strides = [1, 1]} : vector<128x256xf32> to vector<128x128xf32>
    %24 = vector.shape_cast %23 : vector<128x128xf32> to vector<8x16x128xf32>
    %25 = vector.extract_strided_slice %10 {offsets = [0, 0, 0, 0], sizes = [8, 1, 16, 8], strides = [1, 1, 1, 1]} : vector<8x2x16x8xf32> to vector<8x1x16x8xf32>
    %26 = vector.shape_cast %25 : vector<8x1x16x8xf32> to vector<8x16x8xf32>
    %27 = arith.truncf %26 : vector<8x16x8xf32> to vector<8x16x8xbf16>
    %28 = arith.truncf %22 : vector<8x8x128xf32> to vector<8x8x128xbf16>
    "tpu.trace_start"() <{level = 10 : i32, message = "bvq,bqh->bvh"}> : () -> ()
    %cst_21 = arith.constant dense<0.000000e+00> : vector<8x16x128xf32>
    %29 = tpu.matmul %27, %28, %cst_21 {dimension_numbers = #tpu.dot_dimension_numbers<[2], [1], [1], [2], [0, 0, 0, 1, 1, 2], [0], [0]>} : vector<8x16x8xbf16>, vector<8x8x128xbf16>, vector<8x16x128xf32> -> vector<8x16x128xf32>
    "tpu.trace_stop"() : () -> ()
    %30 = arith.mulf %24, %29 : vector<8x16x128xf32>
    %cst_22 = arith.constant dense<0.000000e+00> : vector<8x128xf32>
    %31 = vector.multi_reduction <add>, %30, %cst_22 [1] : vector<8x16x128xf32> to vector<8x128xf32>
    %32 = arith.truncf %31 : vector<8x128xf32> to vector<8x128xbf16>
    %c0_23 = arith.constant 0 : index
    %c0_24 = arith.constant 0 : index
    %c0_25 = arith.constant 0 : index
    %33 = vector.load %arg8[%c0_23, %c0_24, %c0_25] : memref<2x128x128xbf16, #tpu.memory_space<vmem>>, vector<1x128x128xbf16>
    %34 = vector.shape_cast %33 : vector<1x128x128xbf16> to vector<128x128xbf16>
    %cst_26 = arith.constant dense<0.000000e+00> : vector<8x128xf32>
    %35 = tpu.matmul %32, %34, %cst_26 {dimension_numbers = #tpu.dot_dimension_numbers<[1], [0], [0], [1], [0, 0, 1, 1], [], []>} : vector<8x128xbf16>, vector<128x128xbf16>, vector<8x128xf32> -> vector<8x128xf32>
    %c0_27 = arith.constant 0 : index
    %c0_28 = arith.constant 0 : index
    %36 = vector.load %arg9[%c0_27, %c0_28] : memref<2x128xf32, #tpu.memory_space<vmem>>, vector<1x128xf32>
    %37 = vector.broadcast %36 : vector<1x128xf32> to vector<8x128xf32>
    %38 = arith.addf %35, %37 : vector<8x128xf32>
    %39 = vector.shape_cast %38 : vector<8x128xf32> to vector<8x1x128xf32>
    %40 = vector.broadcast %39 : vector<8x1x128xf32> to vector<8x8x128xf32>
    %41 = arith.addf %11, %40 : vector<8x8x128xf32>
    %42 = vector.shape_cast %41 : vector<8x8x128xf32> to vector<64x128xf32>
    %43 = arith.truncf %42 : vector<64x128xf32> to vector<64x128xbf16>
    %c1 = arith.constant 1 : index
    %c0_29 = arith.constant 0 : index
    %c0_30 = arith.constant 0 : index
    %44 = vector.load %arg6[%c1, %c0_29, %c0_30] : memref<2x128x128xbf16, #tpu.memory_space<vmem>>, vector<1x128x128xbf16>
    %45 = vector.shape_cast %44 : vector<1x128x128xbf16> to vector<128x128xbf16>
    %cst_31 = arith.constant dense<0.000000e+00> : vector<64x128xf32>
    %46 = tpu.matmul %43, %45, %cst_31 {dimension_numbers = #tpu.dot_dimension_numbers<[1], [0], [0], [1], [0, 0, 1, 1], [], []>} : vector<64x128xbf16>, vector<128x128xbf16>, vector<64x128xf32> -> vector<64x128xf32>
    %c1_32 = arith.constant 1 : index
    %c0_33 = arith.constant 0 : index
    %47 = vector.load %arg7[%c1_32, %c0_33] : memref<2x128xf32, #tpu.memory_space<vmem>>, vector<1x128xf32>
    %48 = vector.broadcast %47 : vector<1x128xf32> to vector<64x128xf32>
    %49 = arith.addf %46, %48 : vector<64x128xf32>
    %cst_34 = arith.constant 0.000000e+00 : f32
    %50 = vector.broadcast %cst_34 : f32 to vector<64x128xf32>
    %51 = arith.maximumf %49, %50 : vector<64x128xf32>
    %52 = vector.shape_cast %51 : vector<64x128xf32> to vector<8x8x128xf32>
    %53 = vector.extract_strided_slice %9 {offsets = [0, 128], sizes = [128, 128], strides = [1, 1]} : vector<128x256xf32> to vector<128x128xf32>
    %54 = vector.shape_cast %53 : vector<128x128xf32> to vector<8x16x128xf32>
    %55 = vector.extract_strided_slice %10 {offsets = [0, 1, 0, 0], sizes = [8, 1, 16, 8], strides = [1, 1, 1, 1]} : vector<8x2x16x8xf32> to vector<8x1x16x8xf32>
    %56 = vector.shape_cast %55 : vector<8x1x16x8xf32> to vector<8x16x8xf32>
    %57 = arith.truncf %56 : vector<8x16x8xf32> to vector<8x16x8xbf16>
    %58 = arith.truncf %52 : vector<8x8x128xf32> to vector<8x8x128xbf16>
    "tpu.trace_start"() <{level = 10 : i32, message = "bvq,bqh->bvh"}> : () -> ()
    %cst_35 = arith.constant dense<0.000000e+00> : vector<8x16x128xf32>
    %59 = tpu.matmul %57, %58, %cst_35 {dimension_numbers = #tpu.dot_dimension_numbers<[2], [1], [1], [2], [0, 0, 0, 1, 1, 2], [0], [0]>} : vector<8x16x8xbf16>, vector<8x8x128xbf16>, vector<8x16x128xf32> -> vector<8x16x128xf32>
    "tpu.trace_stop"() : () -> ()
    %60 = arith.mulf %54, %59 : vector<8x16x128xf32>
    %cst_36 = arith.constant dense<0.000000e+00> : vector<8x128xf32>
    %61 = vector.multi_reduction <add>, %60, %cst_36 [1] : vector<8x16x128xf32> to vector<8x128xf32>
    %62 = arith.truncf %61 : vector<8x128xf32> to vector<8x128xbf16>
    %c1_37 = arith.constant 1 : index
    %c0_38 = arith.constant 0 : index
    %c0_39 = arith.constant 0 : index
    %63 = vector.load %arg8[%c1_37, %c0_38, %c0_39] : memref<2x128x128xbf16, #tpu.memory_space<vmem>>, vector<1x128x128xbf16>
    %64 = vector.shape_cast %63 : vector<1x128x128xbf16> to vector<128x128xbf16>
    %cst_40 = arith.constant dense<0.000000e+00> : vector<8x128xf32>
    %65 = tpu.matmul %62, %64, %cst_40 {dimension_numbers = #tpu.dot_dimension_numbers<[1], [0], [0], [1], [0, 0, 1, 1], [], []>} : vector<8x128xbf16>, vector<128x128xbf16>, vector<8x128xf32> -> vector<8x128xf32>
    %c1_41 = arith.constant 1 : index
    %c0_42 = arith.constant 0 : index
    %66 = vector.load %arg9[%c1_41, %c0_42] : memref<2x128xf32, #tpu.memory_space<vmem>>, vector<1x128xf32>
    %67 = vector.broadcast %66 : vector<1x128xf32> to vector<8x128xf32>
    %68 = arith.addf %65, %67 : vector<8x128xf32>
    %69 = vector.shape_cast %68 : vector<8x128xf32> to vector<8x1x128xf32>
    %70 = vector.broadcast %69 : vector<8x1x128xf32> to vector<8x8x128xf32>
    %71 = arith.addf %41, %70 : vector<8x8x128xf32>
    %cst_43 = arith.constant dense<0.000000e+00> : vector<8x128xf32>
    %72 = vector.multi_reduction <add>, %71, %cst_43 [1] : vector<8x8x128xf32> to vector<8x128xf32>
    %c0_44 = arith.constant 0 : index
    %c0_45 = arith.constant 0 : index
    %73 = vector.load %arg10[%c0_44, %c0_45] : memref<8x128xf32, #tpu.memory_space<vmem>>, vector<8x128xf32>
    tpu.vector_store %arg10[%c0_44, %c0_45], %72 {strides = array<i32>} : memref<8x128xf32, #tpu.memory_space<vmem>>, vector<8x128xf32>,
    return
  }
  func.func @transform_0(%arg0: i32) -> (i32, i32, i32) {
    %c0_i32 = arith.constant 0 : i32
    %c0_i32_0 = arith.constant 0 : i32
    %c0_i32_1 = arith.constant 0 : i32
    return %arg0, %c0_i32, %c0_i32_0 : i32, i32, i32
  }
  func.func @transform_1(%arg0: i32) -> (i32, i32, i32) {
    %c0_i32 = arith.constant 0 : i32
    %c0_i32_0 = arith.constant 0 : i32
    %c0_i32_1 = arith.constant 0 : i32
    return %arg0, %c0_i32, %c0_i32_0 : i32, i32, i32
  }
  func.func @transform_2(%arg0: i32) -> (i32, i32, i32, i32) {
    %c0_i32 = arith.constant 0 : i32
    %c0_i32_0 = arith.constant 0 : i32
    %c0_i32_1 = arith.constant 0 : i32
    %c0_i32_2 = arith.constant 0 : i32
    return %arg0, %c0_i32, %c0_i32_0, %c0_i32_1 : i32, i32, i32, i32
  }
  func.func @transform_3(%arg0: i32) -> (i32, i32) {
    %c0_i32 = arith.constant 0 : i32
    %c0_i32_0 = arith.constant 0 : i32
    %c0_i32_1 = arith.constant 0 : i32
    return %c0_i32, %c0_i32_0 : i32, i32
  }
  func.func @transform_4(%arg0: i32) -> (i32, i32) {
    %c0_i32 = arith.constant 0 : i32
    %c0_i32_0 = arith.constant 0 : i32
    %c0_i32_1 = arith.constant 0 : i32
    return %c0_i32, %c0_i32_0 : i32, i32
  }
  func.func @transform_5(%arg0: i32) -> (i32, i32, i32) {
    %c0_i32 = arith.constant 0 : i32
    %c0_i32_0 = arith.constant 0 : i32
    %c0_i32_1 = arith.constant 0 : i32
    %c0_i32_2 = arith.constant 0 : i32
    return %c0_i32, %c0_i32_0, %c0_i32_1 : i32, i32, i32
  }
  func.func @transform_6(%arg0: i32) -> (i32, i32) {
    %c0_i32 = arith.constant 0 : i32
    %c0_i32_0 = arith.constant 0 : i32
    %c0_i32_1 = arith.constant 0 : i32
    return %c0_i32, %c0_i32_0 : i32, i32
  }
  func.func @transform_7(%arg0: i32) -> (i32, i32, i32) {
    %c0_i32 = arith.constant 0 : i32
    %c0_i32_0 = arith.constant 0 : i32
    %c0_i32_1 = arith.constant 0 : i32
    %c0_i32_2 = arith.constant 0 : i32
    return %c0_i32, %c0_i32_0, %c0_i32_1 : i32, i32, i32
  }
  func.func @transform_8(%arg0: i32) -> (i32, i32) {
    %c0_i32 = arith.constant 0 : i32
    %c0_i32_0 = arith.constant 0 : i32
    %c0_i32_1 = arith.constant 0 : i32
    return %c0_i32, %c0_i32_0 : i32, i32
  }
  func.func @transform_9(%arg0: i32) -> (i32, i32) {
    %c0_i32 = arith.constant 0 : i32
    %c0_i32_0 = arith.constant 0 : i32
    return %arg0, %c0_i32 : i32, i32
  }
}

</mosaic_0001>

<bundles_post_ra>
// kernel: biresnet_forward.1
= control target key start
LH: loop header
LB: loop body
LE: loop exit
PB: predicated region body
PF: predicated region fallthrough
CT: control target
= control target key end

     0   :  { %14 = vsyncpa [#allocation3], 0  ;;  %s3871_s0 = inlined_call_operand.vmem [shape: f32[16,16,128], index: 0, kind: input, shape index: {}]   ;;  %s3872_s1 = inlined_call_operand.vmem [shape: f32[16,8,128], index: 1, kind: input, shape index: {}]   ;;  %s3873_s2 = inlined_call_operand.vmem [shape: f32[16,2,16,8], index: 2, kind: input, shape index: {}]   ;;  %s3874_s3 = inlined_call_operand.vmem [shape: bf16[128,256], index: 3, kind: input, shape index: {}]   ;;  %s3875_s4 = inlined_call_operand.vmem [shape: f32[1,256], index: 4, kind: input, shape index: {}]   ;;  %s3876_s5 = inlined_call_operand.vmem [shape: bf16[2,128,128], index: 5, kind: input, shape index: {}]   ;;  %s3877_s6 = inlined_call_operand.vmem [shape: f32[2,128], index: 6, kind: input, shape index: {}]   ;;  %s3878_s7 = inlined_call_operand.vmem [shape: bf16[2,128,128], index: 7, kind: input, shape index: {}]   ;;  %s3879_s8 = inlined_call_operand.vmem [shape: f32[2,128], index: 8, kind: input, shape index: {}]   ;;  %s3880_s9 = inlined_call_operand.hbm [shape: f32[16,128], index: 9, kind: output, shape index: {}]  }
   0x1   :  { %16 = vsyncpa [#allocation3 + $0x1], 0  ;;  %s3169_s30 = smov 0   ;;  %s3171_s10 = smov 0  }
   0x2   :  { %s3173_s11 = smov 0   ;;  %s3175_s12 = smov 0  }
   0x3 LB: > { %s3190_s13 = sadd.s32 4294967295, %s3112_s12   ;;  %s2574_s14 = sadd.s32 4294967294, %s3112_s12   ;;  %s3112_s12 = sphi %s3175_s12, %s3886_s12   ;;  %s3108_s11 = sphi %s3173_s11, %s3885_s11   ;;  %s3104_s10 = sphi %s3171_s10, %s3884_s10   ;;  %s3100_s30 = sphi %s3169_s30, %s3883_s30  }
   0x4   : > { %s3194_s15 = sadd.s32 1, %s3112_s12   ;;  %s233_s16 = sadd.s32 1, %s3108_s11 }
   0x5   : > { %s230_s17 = ssub.s32 %s3112_s12, %s3194_s15  ;;  %p243_p0 = scmp.ne.s32.totalorder %s3108_s11, %s3104_s10 }
   0x6   : > { %p231_p1 = scmp.eq.s32.totalorder %s230_s17, 0  ;;  %p244_p2 = scmp.eq.s32.totalorder %s3190_s13, 1 }
   0x7   : > { %p249_p3 = scmp.ne.s32.totalorder %s3104_s10, %s3100_s30  ;;  %p250_p4 = scmp.eq.s32.totalorder %s2574_s14, 1 }
   0x8   : > { %s3205_s18 = scalar_select %p231_p1, %s3108_s11, %s233_s16  }
   0x9   : > { %p3207_p5 = por %p244_p2, %p243_p0  ;;  %p3211_p6 = por %p250_p4, %p249_p3 }
   0xa   : > { %p2577_p7 = scmp.ge.s32.totalorder %s3112_s12, 1  ;;  %p315_p8 = scmp.lt.s32.totalorder %s3112_s12, 3 }
   0xc   : > { %p316_p9 = pnand %p2577_p7, %p315_p8 }
   0xd   : > { %v2994_v0 = vld [vmem:[%s3874_s3 + $0x4] ss:$8 sps:$4 sm:$0xff] (!%p316_p9)   ;;  %v2996_v1 = vld [vmem:[%s3874_s3] ss:$8 sps:$4 sm:$0xff] (!%p316_p9)   ;;  %v3114_v2 = vmov (!%p316_p9), 0   ;;  %s2579_s21 = sshll.u32 (!%p316_p9), %s3190_s13, 3 }
   0xe   : > { %319 = sbr.rel (%p316_p9) target bundleno = 1598 (0x63e), region = 56  ;;  %548 = vmatprep.mubr.bf16.mxu0 (!%p316_p9), %v3114_v2  ;;  %516 = vmatprep.subr.bf16.mxu0 (!%p316_p9), %v2994_v0  ;;  %v2997_v3 = vld [vmem:[%s3874_s3 + $0x14] ss:$8 sps:$4 sm:$0xff] (!%p316_p9)   ;;  %v2999_v4 = vld [vmem:[%s3874_s3 + $0x10] ss:$8 sps:$4 sm:$0xff] (!%p316_p9)   ;;  %p364_p10 = scmp.lt.s32.totalorder (!%p316_p9), %s2579_s21, 15 }
   0xf   : > { %517 = vmatpush1.bf16.msra.mxu0 (!%p316_p9), %v2996_v1  ;;  %v3000_v5 = vld [vmem:[%s3874_s3 + $0x24] ss:$8 sps:$4 sm:$0xff] (!%p316_p9)   ;;  %v3002_v6 = vld [vmem:[%s3874_s3 + $0x20] ss:$8 sps:$4 sm:$0xff] (!%p316_p9)   ;;  %v3003_v7 = vld [vmem:[%s3874_s3 + $0x34] ss:$8 sps:$4 sm:$0xff] (!%p316_p9)  }
  0x10   : > { %518 = vmatprep.subr.bf16.mxu0 (!%p316_p9), %v2997_v3  ;;  %v3005_v8 = vld [vmem:[%s3874_s3 + $0x30] ss:$8 sps:$4 sm:$0xff] (!%p316_p9)   ;;  %v3006_v9 = vld [vmem:[%s3874_s3 + $0x44] ss:$8 sps:$4 sm:$0xff] (!%p316_p9)   ;;  %v3008_v10 = vld [vmem:[%s3874_s3 + $0x40] ss:$8 sps:$4 sm:$0xff] (!%p316_p9)  }
  0x11   : > { %v3009_v11 = vld [vmem:[%s3874_s3 + $0x54] ss:$8 sps:$4 sm:$0xff] (!%p316_p9)   ;;  %v3011_v12 = vld [vmem:[%s3874_s3 + $0x50] ss:$8 sps:$4 sm:$0xff] (!%p316_p9)   ;;  %v3012_v13 = vld [vmem:[%s3874_s3 + $0x64] ss:$8 sps:$4 sm:$0xff] (!%p316_p9)  }
  0x12   : > { %v3014_v14 = vld [vmem:[%s3874_s3 + $0x60] ss:$8 sps:$4 sm:$0xff] (!%p316_p9)   ;;  %v3015_v15 = vld [vmem:[%s3874_s3 + $0x74] ss:$8 sps:$4 sm:$0xff] (!%p316_p9)   ;;  %v3017_v16 = vld [vmem:[%s3874_s3 + $0x70] ss:$8 sps:$4 sm:$0xff] (!%p316_p9)  }
  0x13   : > { %519 = vmatpush1.bf16.msra.mxu0 (!%p316_p9), %v2999_v4  ;;  %v3018_v19 = vld [vmem:[%s3876_s5] sm:$0xff] (!%p316_p9)   ;;  %v3019_v21 = vld [vmem:[%s3876_s5 + $0x8] sm:$0xff] (!%p316_p9)   ;;  %v3020_v24 = vld [vmem:[%s3876_s5 + $0x10] sm:$0xff] (!%p316_p9)   ;;  %v3115_v61 = vmov (!%p316_p9), 0.0   ;;  %vm3116_vm0 = vmmov (!%p316_p9), 0   ;;  %vm867_vm1 = vcmask (!%p316_p9), 1043456  }
  0x14   : > { %520 = vmatprep.subr.bf16.mxu0 (!%p316_p9), %v3000_v5  ;;  %v3021_v26 = vld [vmem:[%s3876_s5 + $0x18] sm:$0xff] (!%p316_p9)   ;;  %v3022_v29 = vld [vmem:[%s3876_s5 + $0x20] sm:$0xff] (!%p316_p9)   ;;  %v3023_v31 = vld [vmem:[%s3876_s5 + $0x28] sm:$0xff] (!%p316_p9)   ;;  %2791 = vmatprep.subr.bf16.mxu1 (!%p316_p9), %v3115_v61  ;;  %vm863_vm2 = vcmask (!%p316_p9), 64512   ;;  %vm1358_vm3 = vcmask (!%p316_p9), 1041409   ;;  %vm1360_vm4 = vcmask (!%p316_p9), 1042434  }
  0x15   : > { %s3888_s21 = smov (!%p364_p10, %s2579_s21), 15  ;;  %v3024_v34 = vld [vmem:[%s3876_s5 + $0x30] sm:$0xff]   ;;  %v3025_v36 = vld [vmem:[%s3876_s5 + $0x38] sm:$0xff]   ;;  %2793 = vmatprep.mubr.msk.bf16.mxu1 %vm3116_vm0, %v3115_v61  ;;  %vm1362_vm5 = vcmask 1043459   ;;  %vm1364_vm6 = vcmask 1044484   ;;  %vm1366_vm7 = vcmask 1045509  }
  0x16   : > { %s2691_s23 = sshll.u32 %s3888_s21, 4  ;;  %s2583_s16 = sshll.u32 %s3888_s21, 3  ;;  %vm1368_vm8 = vcmask 1046534   ;;  %vm1370_vm9 = vcmask 1047559  }
  0x17   : > { %521 = vmatpush1.bf16.msra.mxu0 %v3002_v6  ;;  %s3267_s14 = scalar_lea.vmem %s3871_s0, %s2691_s23  ;;  %s374_s24 = scalar_lea.vmem %s3872_s1, %s2583_s16 }
  0x18   : > { %522 = vmatprep.subr.bf16.mxu0 %v3003_v7  ;;  %v384_v17 = vld [vmem:[%s3267_s14] sm:$0xff]  ;;  %v385_v18 = vld [vmem:[%s3267_s14 + $0x8] sm:$0xff]  ;;  %v386_v22 = vld [vmem:[%s3267_s14 + $0x10] sm:$0xff]  ;;  %s360_s27 = sand.u32 1, %s3104_s10   ;;  %s2688_s29 = sshll.u32 %s3190_s13, 7 }
  0x19   : > { %v400_v20 = vpack.c.bf16 %v385_v18, %v384_v17  ;;  %v387_v23 = vld [vmem:[%s3267_s14 + $0x18] sm:$0xff]  ;;  %v388_v27 = vld [vmem:[%s3267_s14 + $0x20] sm:$0xff]  ;;  %v389_v28 = vld [vmem:[%s3267_s14 + $0x28] sm:$0xff]  ;;  %s2478_s13 = scalar_lea.sflag [#allocation3], %s360_s27  ;;  %s3118_s26 = smov [#allocation2]  }
  0x1a   : > { %v401_v25 = vpack.c.bf16 %v387_v23, %v386_v22  ;;  %v402_v30 = vpack.c.bf16 %v389_v28, %v388_v27  ;;  %v390_v32 = vld [vmem:[%s3267_s14 + $0x30] sm:$0xff]  ;;  %v391_v33 = vld [vmem:[%s3267_s14 + $0x38] sm:$0xff]  ;;  %v392_v37 = vld [vmem:[%s3267_s14 + $0x40] sm:$0xff] }
  0x1b   : > { %523 = vmatpush1.bf16.msra.mxu0 %v3005_v8  ;;  %v403_v35 = vpack.c.bf16 %v391_v33, %v390_v32  ;;  %v393_v38 = vld [vmem:[%s3267_s14 + $0x48] sm:$0xff]  ;;  %v394_v40 = vld [vmem:[%s3267_s14 + $0x50] sm:$0xff]  ;;  %v395_v41 = vld [vmem:[%s3267_s14 + $0x58] sm:$0xff] }
  0x1c   : > { %524 = vmatprep.subr.bf16.mxu0 %v3006_v9  ;;  %v404_v39 = vpack.c.bf16 %v393_v38, %v392_v37  ;;  %v405_v42 = vpack.c.bf16 %v395_v41, %v394_v40  ;;  %v396_v43 = vld [vmem:[%s3267_s14 + $0x60] sm:$0xff]  ;;  %v397_v44 = vld [vmem:[%s3267_s14 + $0x68] sm:$0xff]  ;;  %v398_v46 = vld [vmem:[%s3267_s14 + $0x70] sm:$0xff] }
  0x1d   : > { %v406_v45 = vpack.c.bf16 %v397_v44, %v396_v43  ;;  %v399_v47 = vld [vmem:[%s3267_s14 + $0x78] sm:$0xff]  ;;  %v3326_v48 = vld [vmem:[%s374_s24] sm:$0xff]  ;;  %v3328_v49 = vld [vmem:[%s374_s24 + $0x8] sm:$0xff]  ;;  %s2692_s14 = sshll.u32 %s3888_s21, 5  ;;  %s2578_s21 = sshll.u32 %s360_s27, 3 }
  0x1e   : > { %v407_v50 = vpack.c.bf16 %v399_v47, %v398_v46  ;;  %v701_v51 = vpack.c.bf16 %v3328_v49, %v3326_v48  ;;  %v3332_v52 = vld [vmem:[%s374_s24 + $0x10] sm:$0xff]  ;;  %v3334_v53 = vld [vmem:[%s374_s24 + $0x18] sm:$0xff]  ;;  %v3336_v54 = vld [vmem:[%s374_s24 + $0x20] sm:$0xff]  ;;  %s3429_s28 = scalar_lea.vmem %s3873_s2, %s2692_s14  ;;  %s362_s16 = scalar_lea.vmem [#allocation2], %s2578_s21 }
  0x1f   : > { %525 = vmatpush1.bf16.msra.mxu0 %v3008_v10  ;;  %v3338_v55 = vld [vmem:[%s374_s24 + $0x28] sm:$0xff]  ;;  %v702_v56 = vpack.c.bf16 %v3334_v53, %v3332_v52  ;;  %v3344_v58 = vld [vmem:[%s374_s24 + $0x30] sm:$0xff]  ;;  %v3346_v59 = vld [vmem:[%s374_s24 + $0x38] sm:$0xff]  ;;  %s2491_s17 = sshll.u32 %s362_s16, 4  ;;  %s3826_s14 = scalar_lea.hbm %s3880_s9, %s2688_s29  ;;  %s3828_s17 = int_to_ptr.vmem [resolvable:$true] %s2491_s17 }
  0x20   : > { %526 = vmatprep.subr.bf16.mxu0 %v3009_v11  ;;  %v703_v57 = vpack.c.bf16 %v3338_v55, %v3336_v54  ;;  %v704_v60 = vpack.c.bf16 %v3346_v59, %v3344_v58  ;;  %v661_v38 = vld [vmem:[%s3429_s28] sm:$0xff]  ;;  %s3050_s25 = scalar_lea.vmem %s3828_s17, 128 }
  0x21   : > { %p3051_p11 = scmp.ne.s32.totalorder %s3828_s17, %s3050_s25 }
  0x23   : > { %527 = vmatpush1.bf16.msra.mxu0 %v3011_v12  ;;  %p3052_p12 = pnand %p3051_p11, %p3207_p5 }
  0x24   : > { %528 = vmatprep.subr.bf16.mxu0 %v3012_v13 }
  0x25   : > { %p3053_p13 = pneg %p3052_p12 }
  0x27   : > { %529 = vmatpush1.bf16.msra.mxu0 %v3014_v14 }
  0x28   : > { %530 = vmatprep.subr.bf16.mxu0 %v3015_v15 }
  0x2b   : > { %531 = vmatpush1.bf16.msra.mxu0 %v3017_v16 }
  0x2c   : > { %2767 = vmatprep.subr.bf16.mxu0 %v3018_v19 }
  0x2e   : > { %549 = vmatmul.mubr.bf16.vlgmr.msra.gmra.mrb[0].mxu0 %v400_v20 }
  0x2f   : > { %558 = vmatprep.mubr.bf16.mxu0 %v3114_v2  ;;  %2768 = vmatpush3.bf16.msra.mxu0 %v3018_v19 }
  0x30   : > { %2769 = vmatprep.subr.bf16.mxu0 %v3019_v21 }
  0x33   : > { %2770 = vmatpush3.bf16.msra.mxu0 %v3019_v21 }
  0x34   : > { %2771 = vmatprep.subr.bf16.mxu0 %v3020_v24 }
  0x36   : > { %559 = vmatmul.mubr.bf16.gmra.mrb[4].mxu0 %v401_v25 }
  0x37   : > { %568 = vmatprep.mubr.bf16.mxu0 %v3114_v2  ;;  %2772 = vmatpush3.bf16.msra.mxu0 %v3020_v24 }
  0x38   : > { %2773 = vmatprep.subr.bf16.mxu0 %v3021_v26 }
  0x3b   : > { %2774 = vmatpush3.bf16.msra.mxu0 %v3021_v26 }
  0x3c   : > { %2775 = vmatprep.subr.bf16.mxu0 %v3022_v29 }
  0x3e   : > { %569 = vmatmul.mubr.bf16.gmra.mrb[8].mxu0 %v402_v30  ;;  %v3424_v30 = vld [vmem:[%s3877_s6] ss:$0 sm:$0xff] }
  0x3f   : > { %578 = vmatprep.mubr.bf16.mxu0 %v3114_v2  ;;  %2776 = vmatpush3.bf16.msra.mxu0 %v3022_v29 }
  0x40   : > { %2777 = vmatprep.subr.bf16.mxu0 %v3023_v31 }
  0x43   : > { %2778 = vmatpush3.bf16.msra.mxu0 %v3023_v31 }
  0x44   : > { %2779 = vmatprep.subr.bf16.mxu0 %v3024_v34 }
  0x46   : > { %579 = vmatmul.mubr.bf16.gmra.mrb[12].mxu0 %v403_v35 }
  0x47   : > { %588 = vmatprep.mubr.bf16.mxu0 %v3114_v2  ;;  %2780 = vmatpush3.bf16.msra.mxu0 %v3024_v34 }
  0x48   : > { %2781 = vmatprep.subr.bf16.mxu0 %v3025_v36 }
  0x4b   : > { %2782 = vmatpush3.bf16.msra.mxu0 %v3025_v36 }
  0x4c   : > { %2839 = vmatprep.subr.bf16.mxu0 %v3115_v61 }
  0x4e   : > { %589 = vmatmul.mubr.bf16.gmra.mrb[16].mxu0 %v404_v39  ;;  %v662_v39 = vld [vmem:[%s3429_s28 + $0x8] sm:$0xff] }
  0x4f   : > { %598 = vmatprep.mubr.bf16.mxu0 %v3114_v2 }
  0x56   : > { %599 = vmatmul.mubr.bf16.gmra.mrb[20].mxu0 %v405_v42 }
  0x57   : > { %608 = vmatprep.mubr.bf16.mxu0 %v3114_v2 }
  0x5e   : > { %609 = vmatmul.mubr.bf16.gmra.mrb[24].mxu0 %v406_v45  ;;  %v847_v45 = vpack.c.bf16 %v662_v39, %v661_v38  ;;  %v669_v38 = vld [vmem:[%s3429_s28 + $0x40] sm:$0xff]  ;;  %v670_v39 = vld [vmem:[%s3429_s28 + $0x48] sm:$0xff] }
  0x5f   : > { %618 = vmatprep.mubr.bf16.mxu0 %v3114_v2 }
  0x66   : > { %619 = vmatmul.mubr.bf16.gmra.mrb[28].mxu0 %v407_v50 }
  0x67   : > { %2783 = vmatprep.mubr.bf16.mxu0 %v701_v51 }
  0x6e   : > { %2784 = vmatmul.mubr.bf16.vlgmr.msra.gmra.mrb[32].mxu0 %v702_v56 }
  0x6f   : > { %2787 = vmatprep.mubr.bf16.mxu0 %v703_v57 }
  0x76   : > { %2788 = vmatmul.mubr.bf16.gmra.mrb[36].mxu0 %v704_v60  ;;  %v665_v60 = vld [vmem:[%s3429_s28 + $0x20] sm:$0xff] }
  0x77   : > { %2855 = vmatprep.mubr.msk.bf16.mxu0 %vm3116_vm0, %v3115_v61 }
 0x101   : > { %v3356_v62 = vpop.f32.mrb[0].mxu0 }
 0x102   : > { %v3358_v63 = vpop.f32.mrb[1].mxu0 }
 0x103   : > { %v3360_v0 = vpop.f32.mrb[2].mxu0 }
 0x104   : > { %v3362_v1 = vpop.f32.mrb[3].mxu0 }
 0x109   : > { %v3364_v2 = vpop.f32.mrb[4].mxu0 }
 0x10a   : > { %v3366_v3 = vpop.f32.mrb[5].mxu0 }
 0x10b   : > { %v3368_v4 = vpop.f32.mrb[6].mxu0 }
 0x10c   : > { %v3370_v5 = vpop.f32.mrb[7].mxu0 }
 0x111   : > { %v3372_v6 = vpop.f32.mrb[8].mxu0 }
 0x112   : > { %v3374_v7 = vpop.f32.mrb[9].mxu0 }
 0x113   : > { %v3376_v8 = vpop.f32.mrb[10].mxu0 }
 0x114   : > { %v3378_v9 = vpop.f32.mrb[11].mxu0 }
 0x119   : > { %v3380_v10 = vpop.f32.mrb[12].mxu0 }
 0x11a   : > { %v3382_v11 = vpop.f32.mrb[13].mxu0 }
 0x11b   : > { %v3384_v12 = vpop.f32.mrb[14].mxu0 }
 0x11c   : > { %v3386_v13 = vpop.f32.mrb[15].mxu0 }
 0x121   : > { %v3388_v14 = vpop.f32.mrb[16].mxu0 }
 0x122   : > { %v3390_v15 = vpop.f32.mrb[17].mxu0 }
 0x123   : > { %v3392_v16 = vpop.f32.mrb[18].mxu0 }
 0x124   : > { %v3394_v17 = vpop.f32.mrb[19].mxu0 }
 0x129   : > { %v3396_v18 = vpop.f32.mrb[20].mxu0 }
 0x12a   : > { %v3398_v19 = vpop.f32.mrb[21].mxu0 }
 0x12b   : > { %v3400_v20 = vpop.f32.mrb[22].mxu0 }
 0x12c   : > { %v3402_v21 = vpop.f32.mrb[23].mxu0 }
 0x131   : > { %v3404_v22 = vpop.f32.mrb[24].mxu0 }
 0x132   : > { %v3406_v23 = vpop.f32.mrb[25].mxu0 }
 0x133   : > { %v3408_v24 = vpop.f32.mrb[26].mxu0 }
 0x134   : > { %v3410_v25 = vpop.f32.mrb[27].mxu0 }
 0x139   : > { %v3412_v26 = vpop.f32.mrb[28].mxu0 }
 0x13a   : > { %v3414_v27 = vpop.f32.mrb[29].mxu0 }
 0x13b   : > { %v3416_v28 = vpop.f32.mrb[30].mxu0 }
 0x13c   : > { %v3418_v29 = vpop.f32.mrb[31].mxu0 }
 0x141   : > { %v2785_v31 = vpop.f32.mrb[32].mxu0 }
 0x142   : > { %v808_v32 = vpop.f32.mrb[33].mxu0  ;;  %v817_v42 = vadd.f32 %v2785_v31, %v3424_v30  ;;  %v666_v31 = vld [vmem:[%s3429_s28 + $0x28] sm:$0xff] }
 0x143   : > { %v809_v33 = vadd.f32 %v3424_v30, %v808_v32  ;;  %v2786_v34 = vpop.f32.mrb[34].mxu0 }
 0x144   : > { %v811_v35 = vpop.f32.mrb[35].mxu0  ;;  %v841_v56 = vmax.f32 %v817_v42, 0.0 }
 0x145   : > { %v839_v36 = vmax.f32 %v809_v33, 0.0  ;;  %v812_v37 = vadd.f32 %v3424_v30, %v811_v35  ;;  %v820_v33 = vadd.f32 %v2786_v34, %v3424_v30  ;;  %v848_v35 = vpack.c.bf16 %v666_v31, %v665_v60 }
 0x146   : > { %v857_v32 = vpack.c.bf16 %v841_v56, %v841_v56  ;;  %v849_v34 = vpack.c.bf16 %v670_v39, %v669_v38  ;;  %v681_v39 = vld [vmem:[%s3429_s28 + $0xa0] sm:$0xff] }
 0x147   : > { %v855_v40 = vpack.c.bf16 %v839_v36, %v839_v36  ;;  %v840_v41 = vmax.f32 %v812_v37, 0.0  ;;  %v842_v36 = vmax.f32 %v820_v33, 0.0  ;;  %v678_v33 = vld [vmem:[%s3429_s28 + $0x88] sm:$0xff] }
 0x148   : > { %v963_v37 = vsel %vm867_vm1, %v857_v32, 0  ;;  %v677_v32 = vld [vmem:[%s3429_s28 + $0x80] sm:$0xff] }
 0x149   : > { %v856_v43 = vpack.c.bf16 %v840_v41, %v840_v41  ;;  %v869_v44 = vsel %vm867_vm1, %v855_v40, 0  ;;  %v2789_v46 = vpop.f32.mrb[36].mxu0  ;;  %v858_v41 = vpack.c.bf16 %v842_v36, %v842_v36 }
 0x14a   : > { %2792 = vmatpush3.bf16.msra.mxu1 %v869_v44  ;;  %v824_v47 = vpop.f32.mrb[37].mxu0  ;;  %v673_v44 = vld [vmem:[%s3429_s28 + $0x60] sm:$0xff] }
 0x14b   : > { %2797 = vmatprep.subr.bf16.mxu1 %v3115_v61  ;;  %v2790_v50 = vpop.f32.mrb[38].mxu0  ;;  %v916_v57 = vsel %vm867_vm1, %v856_v43, 0  ;;  %v825_v40 = vadd.f32 %v3424_v30, %v824_v47  ;;  %v1010_v43 = vsel %vm867_vm1, %v858_v41, 0 }
 0x14c   : > { %v827_v51 = vpop.f32.mrb[39].mxu0 }
 0x14d   : > { %2794 = vmatmul.mubr.msk.bf16.vlgmr.msra.gmra.mrb[0].mxu1 %vm863_vm2, %v847_v45  ;;  %v843_v42 = vmax.f32 %v825_v40, 0.0  ;;  %v674_v45 = vld [vmem:[%s3429_s28 + $0x68] sm:$0xff]  ;;  %v828_v47 = vadd.f32 %v3424_v30, %v827_v51  ;;  %v851_v51 = vpack.c.bf16 %v678_v33, %v677_v32  ;;  %v3028_v33 = vld [vmem:[%s3878_s7 + $0x10] sm:$0xff]  }
 0x14e   : > { %2798 = vmatpush3.bf16.msra.mxu1 %v916_v57  ;;  %2799 = vmatprep.mubr.msk.bf16.mxu1 %vm3116_vm0, %v3115_v61  ;;  %v850_v57 = vpack.c.bf16 %v674_v45, %v673_v44  ;;  %v682_v40 = vld [vmem:[%s3429_s28 + $0xa8] sm:$0xff]  ;;  %v685_v44 = vld [vmem:[%s3429_s28 + $0xc0] sm:$0xff] }
 0x14f   : > { %2803 = vmatprep.subr.bf16.mxu1 %v3115_v61  ;;  %v859_v56 = vpack.c.bf16 %v843_v42, %v843_v42  ;;  %v844_v31 = vmax.f32 %v828_v47, 0.0  ;;  %v686_v45 = vld [vmem:[%s3429_s28 + $0xc8] sm:$0xff] }
 0x150   : > { %v853_v47 = vpack.c.bf16 %v686_v45, %v685_v44  ;;  %v3027_v32 = vld [vmem:[%s3878_s7 + $0x8] sm:$0xff]   ;;  %v3544_v44 = vld [vmem:[%s3875_s4] sm:$0x3] }
 0x151   : > { %v1057_v60 = vsel %vm867_vm1, %v859_v56, 0  ;;  %v860_v36 = vpack.c.bf16 %v844_v31, %v844_v31  ;;  %v3026_v31 = vld [vmem:[%s3878_s7] sm:$0xff]  }
 0x152   : > { %2840 = vmatpush3.bf16.msra.mxu0 %v3026_v31 }
 0x153   : > { %v1104_v38 = vsel %vm867_vm1, %v860_v36, 0  ;;  %2841 = vmatprep.subr.bf16.mxu0 %v3115_v61  ;;  %v3030_v36 = vld [vmem:[%s3878_s7 + $0x20] sm:$0xff]  }
 0x155   : > { %2800 = vmatmul.mubr.msk.bf16.vlgmr.msra.gmra.mrb[4].mxu1 %vm863_vm2, %v848_v35  ;;  %v833_v35 = vadd.f32 %v2789_v46, %v3424_v30  ;;  %v836_v46 = vadd.f32 %v2790_v50, %v3424_v30  ;;  %v689_v50 = vld [vmem:[%s3429_s28 + $0xe0] sm:$0xff] }
 0x156   : > { %2804 = vmatpush3.bf16.msra.mxu1 %v963_v37  ;;  %2805 = vmatprep.mubr.msk.bf16.mxu1 %vm3116_vm0, %v3115_v61 }
 0x157   : > { %2809 = vmatprep.subr.bf16.mxu1 %v3115_v61  ;;  %v845_v37 = vmax.f32 %v833_v35, 0.0  ;;  %v846_v42 = vmax.f32 %v836_v46, 0.0  ;;  %2842 = vmatpush3.bf16.msra.mxu0 %v3027_v32  ;;  %v3029_v35 = vld [vmem:[%s3878_s7 + $0x18] sm:$0xff]  }
 0x158   : > { %2843 = vmatprep.subr.bf16.mxu0 %v3115_v61  ;;  %v3037_v46 = vld [vmem:[%s3876_s5 + $0x58] sm:$0xff]  }
 0x159   : > { %v861_v41 = vpack.c.bf16 %v845_v37, %v845_v37  ;;  %v862_v56 = vpack.c.bf16 %v846_v42, %v846_v42  ;;  %v3032_v37 = vld [vmem:[%s3878_s7 + $0x30] sm:$0xff]  }
 0x15b   : > { %v1198_v30 = vsel %vm867_vm1, %v862_v56, 0  ;;  %2844 = vmatpush3.bf16.msra.mxu0 %v3028_v33 }
 0x15c   : > { %2845 = vmatprep.subr.bf16.mxu0 %v3115_v61 }
 0x15d   : > { %2806 = vmatmul.mubr.msk.bf16.vlgmr.msra.gmra.mrb[8].mxu1 %vm863_vm2, %v849_v34  ;;  %v852_v34 = vpack.c.bf16 %v682_v40, %v681_v39  ;;  %v3034_v39 = vld [vmem:[%s3876_s5 + $0x40] sm:$0xff]   ;;  %v3035_v40 = vld [vmem:[%s3876_s5 + $0x48] sm:$0xff]  }
 0x15e   : > { %2810 = vmatpush3.bf16.msra.mxu1 %v1010_v43  ;;  %2811 = vmatprep.mubr.msk.bf16.mxu1 %vm3116_vm0, %v3115_v61  ;;  %v1151_v43 = vsel %vm867_vm1, %v861_v41, 0  ;;  %v3036_v41 = vld [vmem:[%s3876_s5 + $0x50] sm:$0xff]  }
 0x15f   : > { %2815 = vmatprep.subr.bf16.mxu1 %v3115_v61  ;;  %2846 = vmatpush3.bf16.msra.mxu0 %v3029_v35 }
 0x160   : > { %2847 = vmatprep.subr.bf16.mxu0 %v3115_v61 }
 0x163   : > { %2848 = vmatpush3.bf16.msra.mxu0 %v3030_v36 }
 0x164   : > { %2849 = vmatprep.subr.bf16.mxu0 %v3115_v61 }
 0x165   : > { %2812 = vmatmul.mubr.msk.bf16.vlgmr.msra.gmra.mrb[12].mxu1 %vm863_vm2, %v850_v57  ;;  %v690_v57 = vld [vmem:[%s3429_s28 + $0xe8] sm:$0xff] }
 0x166   : > { %2816 = vmatpush3.bf16.msra.mxu1 %v1057_v60  ;;  %2817 = vmatprep.mubr.msk.bf16.mxu1 %vm3116_vm0, %v3115_v61  ;;  %v854_v60 = vpack.c.bf16 %v690_v57, %v689_v50 }
 0x167   : > { %2821 = vmatprep.subr.bf16.mxu1 %v3115_v61 }
 0x16d   : > { %2818 = vmatmul.mubr.msk.bf16.vlgmr.msra.gmra.mrb[16].mxu1 %vm863_vm2, %v851_v51  ;;  %v3031_v51 = vld [vmem:[%s3878_s7 + $0x28] sm:$0xff]  }
 0x16e   : > { %2822 = vmatpush3.bf16.msra.mxu1 %v1104_v38  ;;  %2823 = vmatprep.mubr.msk.bf16.mxu1 %vm3116_vm0, %v3115_v61  ;;  %v3033_v38 = vld [vmem:[%s3878_s7 + $0x38] sm:$0xff]  }
 0x16f   : > { %2827 = vmatprep.subr.bf16.mxu1 %v3115_v61  ;;  %2850 = vmatpush3.bf16.msra.mxu0 %v3031_v51 }
 0x170   : > { %2851 = vmatprep.subr.bf16.mxu0 %v3115_v61 }
 0x173   : > { %2852 = vmatpush3.bf16.msra.mxu0 %v3032_v37 }
 0x174   : > { %2853 = vmatprep.subr.bf16.mxu0 %v3115_v61 }
 0x175   : > { %2824 = vmatmul.mubr.msk.bf16.vlgmr.msra.gmra.mrb[20].mxu1 %vm863_vm2, %v852_v34  ;;  %v426_v34 = vlaneseq }
 0x176   : > { %2828 = vmatpush3.bf16.msra.mxu1 %v1151_v43  ;;  %2829 = vmatprep.mubr.msk.bf16.mxu1 %vm3116_vm0, %v3115_v61 }
 0x177   : > { %2833 = vmatprep.subr.bf16.mxu1 %v3115_v61  ;;  %2854 = vmatpush3.bf16.msra.mxu0 %v3033_v38  ;;  %v3536_v42 = vshrl.u32 %v426_v34, 7 }
 0x178   : > { %2889 = vmatprep.subr.bf16.mxu0 %v3115_v61 }
 0x179   : > { %v3539_v43 = vsub.s32 0, %v3536_v42 }
 0x17b   : > { %v3548_v45 = vrot.slane %v3544_v44, %v3539_v43 }
 0x17d   : > { %2830 = vmatmul.mubr.msk.bf16.vlgmr.msra.gmra.mrb[24].mxu1 %vm863_vm2, %v853_v47  ;;  %v551_v56 = vadd.f32 %v3356_v62, %v3548_v45  ;;  %v555_v47 = vadd.f32 %v3360_v0, %v3548_v45  ;;  %v561_v33 = vadd.f32 %v3364_v2, %v3548_v45  ;;  %v565_v51 = vadd.f32 %v3368_v4, %v3548_v45 }
 0x17e   : > { %2834 = vmatpush3.bf16.msra.mxu1 %v1198_v30  ;;  %2835 = vmatprep.mubr.msk.bf16.mxu1 %vm3116_vm0, %v3115_v61 }
 0x17f   : > { %2859 = vmatprep.subr.bf16.mxu1 %v3034_v39  ;;  %v629_v30 = vmax.f32 %v551_v56, 0.0  ;;  %v631_v57 = vmax.f32 %v555_v47, 0.0  ;;  %v633_v38 = vmax.f32 %v561_v33, 0.0  ;;  %v571_v56 = vadd.f32 %v3372_v6, %v3548_v45 }
 0x180   : > { %v581_v6 = vadd.f32 %v3380_v10, %v3548_v45 }
 0x185   : > { %2836 = vmatmul.mubr.msk.bf16.vlgmr.msra.gmra.mrb[28].mxu1 %vm863_vm2, %v854_v60 }
 0x186   : > { %2860 = vmatpush3.bf16.msra.mxu1 %v3034_v39 }
 0x187   : > { %2861 = vmatprep.subr.bf16.mxu1 %v3035_v40 }
 0x18a   : > { %2862 = vmatpush3.bf16.msra.mxu1 %v3035_v40  ;;  %v635_v40 = vmax.f32 %v565_v51, 0.0 }
 0x18b   : > { %2863 = vmatprep.subr.bf16.mxu1 %v3036_v41 }
 0x18e   : > { %2864 = vmatpush3.bf16.msra.mxu1 %v3036_v41 }
 0x18f   : > { %2865 = vmatprep.subr.bf16.mxu1 %v3037_v46 }
 0x192   : > { %2866 = vmatpush3.bf16.msra.mxu1 %v3037_v46 }
 0x220   : > { %v905_v50 = vpop.f32.mrb[0].mxu1 }
 0x221   : > { %v1241_v60 = vmul.f32 %v905_v50, %v629_v30  ;;  %v2795_v31 = vpop.f32.mrb[1].mxu1  ;;  %v575_v50 = vadd.f32 %v3376_v8, %v3548_v45  ;;  %v585_v8 = vadd.f32 %v3384_v12, %v3548_v45 }
 0x222   : > { %v908_v32 = vpop.f32.mrb[2].mxu1 }
 0x223   : > { %v1242_v35 = vmul.f32 %v908_v32, %v631_v57  ;;  %v2796_v36 = vpop.f32.mrb[3].mxu1  ;;  %v639_v33 = vmax.f32 %v575_v50, 0.0 }
 0x225   : > { %v1257_v37 = vadd.f32 %v1242_v35, %v1241_v60  ;;  %v637_v60 = vmax.f32 %v571_v56, 0.0 }
 0x227   : > { %v1258_v62 = vrot.slane %v1257_v37, 4 }
 0x228   : > { %v952_v39 = vpop.f32.mrb[4].mxu1 }
 0x229   : > { %v1259_v0 = vadd.f32 %v1258_v62, %v1257_v37  ;;  %v1243_v41 = vmul.f32 %v952_v39, %v633_v38  ;;  %v2801_v46 = vpop.f32.mrb[5].mxu1 }
 0x22a   : > { %v955_v34 = vpop.f32.mrb[6].mxu1 }
 0x22b   : > { %v1260_v47 = vrot.slane %v1259_v0, 2  ;;  %v1244_v30 = vmul.f32 %v955_v34, %v635_v40  ;;  %v2802_v2 = vpop.f32.mrb[7].mxu1  ;;  %v641_v34 = vmax.f32 %v581_v6, 0.0 }
 0x22d   : > { %v1261_v57 = vadd.f32 %v1260_v47, %v1259_v0  ;;  %v1264_v4 = vadd.f32 %v1244_v30, %v1243_v41  ;;  %v643_v30 = vmax.f32 %v585_v8, 0.0 }
 0x22f   : > { %v1265_v31 = vrot.slane %v1264_v4, 4  ;;  %v1262_v35 = vrot.slane %v1261_v57, 1 }
 0x230   : > { %v999_v32 = vpop.f32.mrb[8].mxu1 }
 0x231   : > { %v1266_v36 = vadd.f32 %v1265_v31, %v1264_v4  ;;  %v1245_v51 = vmul.f32 %v999_v32, %v637_v60  ;;  %v2807_v37 = vpop.f32.mrb[9].mxu1  ;;  %v1263_v0 = vadd.f32 %v1262_v35, %v1261_v57  ;;  %v595_v35 = vadd.f32 %v3392_v16, %v3548_v45 }
 0x232   : > { %v1002_v38 = vpop.f32.mrb[10].mxu1  ;;  %v601_v16 = vadd.f32 %v3396_v18, %v3548_v45 }
 0x233   : > { %v1267_v62 = vrot.slane %v1266_v36, 2  ;;  %v1246_v39 = vmul.f32 %v1002_v38, %v639_v33  ;;  %v2808_v40 = vpop.f32.mrb[11].mxu1  ;;  %v1313_v50 = vpack.c.bf16 %v1263_v0, %v1263_v0  ;;  %v591_v33 = vadd.f32 %v3388_v14, %v3548_v45 }
 0x235   : > { %v1268_v41 = vadd.f32 %v1267_v62, %v1266_v36  ;;  %v1271_v46 = vadd.f32 %v1246_v39, %v1245_v51  ;;  %v1350_v36 = vunpack.c.l.b16 %v1313_v50  ;;  %v645_v39 = vmax.f32 %v591_v33, 0.0 }
 0x237   : > { %v1269_v56 = vrot.slane %v1268_v41, 1  ;;  %v1272_v47 = vrot.slane %v1271_v46, 4 }
 0x238   : > { %v1046_v2 = vpop.f32.mrb[12].mxu1 }
 0x239   : > { %v1270_v4 = vadd.f32 %v1269_v56, %v1268_v41  ;;  %v1273_v60 = vadd.f32 %v1272_v47, %v1271_v46  ;;  %v1247_v31 = vmul.f32 %v1046_v2, %v641_v34  ;;  %v2813_v32 = vpop.f32.mrb[13].mxu1  ;;  %v647_v46 = vmax.f32 %v595_v35, 0.0 }
 0x23a   : > { %v1049_v10 = vpop.f32.mrb[14].mxu1 }
 0x23b   : > { %v1314_v37 = vpack.c.bf16 %v1270_v4, %v1270_v4  ;;  %v1274_v38 = vrot.slane %v1273_v60, 2  ;;  %v1248_v12 = vmul.f32 %v1049_v10, %v643_v30  ;;  %v2814_v57 = vpop.f32.mrb[15].mxu1 }
 0x23d   : > { %v1351_v51 = vunpack.c.l.b16 %v1314_v37  ;;  %v1275_v6 = vadd.f32 %v1274_v38, %v1273_v60  ;;  %v1278_v62 = vadd.f32 %v1248_v12, %v1247_v31  ;;  %v605_v31 = vadd.f32 %v3400_v20, %v3548_v45 }
 0x23e   : > { %v649_v37 = vmax.f32 %v601_v16, 0.0 }
 0x23f   : > { %v1359_v40 = vsel %vm1358_vm3, %v1351_v51, %v1350_v36  ;;  %v1276_v8 = vrot.slane %v1275_v6, 1  ;;  %v1279_v0 = vrot.slane %v1278_v62, 4  ;;  %v651_v36 = vmax.f32 %v605_v31, 0.0 }
 0x240   : > { %v1093_v41 = vpop.f32.mrb[16].mxu1 }
 0x241   : > { %v1277_v14 = vadd.f32 %v1276_v8, %v1275_v6  ;;  %v1280_v34 = vadd.f32 %v1279_v0, %v1278_v62  ;;  %v1249_v56 = vmul.f32 %v1093_v41, %v645_v39  ;;  %v2819_v47 = vpop.f32.mrb[17].mxu1  ;;  %v611_v8 = vadd.f32 %v3404_v22, %v3548_v45 }
 0x242   : > { %v1096_v30 = vpop.f32.mrb[18].mxu1 }
 0x243   : > { %v1315_v2 = vpack.c.bf16 %v1277_v14, %v1277_v14  ;;  %v1281_v50 = vrot.slane %v1280_v34, 2  ;;  %v1250_v4 = vmul.f32 %v1096_v30, %v647_v46  ;;  %v2820_v60 = vpop.f32.mrb[19].mxu1  ;;  %v653_v47 = vmax.f32 %v611_v8, 0.0 }
 0x245   : > { %v1352_v32 = vunpack.c.l.b16 %v1315_v2  ;;  %v1282_v10 = vadd.f32 %v1281_v50, %v1280_v34  ;;  %v1285_v33 = vadd.f32 %v1250_v4, %v1249_v56 }
 0x247   : > { %v1361_v38 = vsel %vm1360_vm4, %v1352_v32, %v1359_v40  ;;  %v1283_v12 = vrot.slane %v1282_v10, 1  ;;  %v1286_v57 = vrot.slane %v1285_v33, 4  ;;  %v615_v40 = vadd.f32 %v3408_v24, %v3548_v45 }
 0x248   : > { %v1140_v35 = vpop.f32.mrb[20].mxu1 }
 0x249   : > { %v1284_v51 = vadd.f32 %v1283_v12, %v1282_v10  ;;  %v1287_v18 = vadd.f32 %v1286_v57, %v1285_v33  ;;  %v1251_v6 = vmul.f32 %v1140_v35, %v649_v37  ;;  %v2825_v62 = vpop.f32.mrb[21].mxu1  ;;  %v655_v4 = vmax.f32 %v615_v40, 0.0 }
 0x24a   : > { %v1143_v39 = vpop.f32.mrb[22].mxu1  ;;  %v621_v33 = vadd.f32 %v3412_v26, %v3548_v45 }
 0x24b   : > { %v1316_v0 = vpack.c.bf16 %v1284_v51, %v1284_v51  ;;  %v1288_v20 = vrot.slane %v1287_v18, 2  ;;  %v1252_v41 = vmul.f32 %v1143_v39, %v651_v36  ;;  %v2826_v46 = vpop.f32.mrb[23].mxu1 }
 0x24d   : > { %v1353_v14 = vunpack.c.l.b16 %v1316_v0  ;;  %v1289_v34 = vadd.f32 %v1288_v20, %v1287_v18  ;;  %v1292_v56 = vadd.f32 %v1252_v41, %v1251_v6  ;;  %v657_v18 = vmax.f32 %v621_v33, 0.0 }
 0x24f   : > { %v1363_v30 = vsel %vm1362_vm5, %v1353_v14, %v1361_v38  ;;  %v1290_v16 = vrot.slane %v1289_v34, 1  ;;  %v1293_v2 = vrot.slane %v1292_v56, 4  ;;  %v625_v38 = vadd.f32 %v3416_v28, %v3548_v45 }
 0x250   : > { %v1187_v50 = vpop.f32.mrb[24].mxu1 }
 0x251   : > { %v1291_v60 = vadd.f32 %v1290_v16, %v1289_v34  ;;  %v1294_v22 = vadd.f32 %v1293_v2, %v1292_v56  ;;  %v1253_v31 = vmul.f32 %v1187_v50, %v653_v47  ;;  %v2831_v32 = vpop.f32.mrb[25].mxu1  ;;  %v659_v0 = vmax.f32 %v625_v38, 0.0 }
 0x252   : > { %v1190_v10 = vpop.f32.mrb[26].mxu1 }
 0x253   : > { %v1317_v37 = vpack.c.bf16 %v1291_v60, %v1291_v60  ;;  %v1295_v24 = vrot.slane %v1294_v22, 2  ;;  %v1254_v12 = vmul.f32 %v1190_v10, %v655_v4  ;;  %v2832_v57 = vpop.f32.mrb[27].mxu1 }
 0x255   : > { %v1354_v35 = vunpack.c.l.b16 %v1317_v37  ;;  %v1296_v36 = vadd.f32 %v1295_v24, %v1294_v22  ;;  %v1299_v51 = vadd.f32 %v1254_v12, %v1253_v31 }
 0x257   : > { %v1365_v6 = vsel %vm1364_vm6, %v1354_v35, %v1363_v30  ;;  %v1297_v62 = vrot.slane %v1296_v36, 1  ;;  %v1300_v39 = vrot.slane %v1299_v51, 4 }
 0x258   : > { %v1234_v8 = vpop.f32.mrb[28].mxu1 }
 0x259   : > { %v1298_v20 = vadd.f32 %v1297_v62, %v1296_v36  ;;  %v1301_v26 = vadd.f32 %v1300_v39, %v1299_v51  ;;  %v1255_v41 = vmul.f32 %v1234_v8, %v657_v18  ;;  %v2837_v46 = vpop.f32.mrb[29].mxu1  ;;  %v3038_v36 = vld [vmem:[%s3876_s5 + $0x60] sm:$0xff]   ;;  %v3039_v51 = vld [vmem:[%s3876_s5 + $0x68] sm:$0xff]   ;;  %v3040_v18 = vld [vmem:[%s3876_s5 + $0x70] sm:$0xff]   ;;  %v3117_v62 = vmov 1966171168  }
 0x25a   : > { %v1237_v40 = vpop.f32.mrb[30].mxu1  ;;  %2867 = vmatprep.subr.bf16.mxu1 %v3038_v36  ;;  %v1465_v39 = vunpack.c.l.s4 %v3117_v62 }
 0x25b   : > { %v1318_v14 = vpack.c.bf16 %v1298_v20, %v1298_v20  ;;  %v1302_v34 = vrot.slane %v1301_v26, 2  ;;  %v1256_v56 = vmul.f32 %v1237_v40, %v659_v0  ;;  %v2838_v47 = vpop.f32.mrb[31].mxu1  ;;  %2868 = vmatpush3.bf16.msra.mxu1 %v3038_v36  ;;  %v2620_v0 = vld [vmem:[%s3879_s8] ss:$0 sm:$0xff] }
 0x25c   : > { %2869 = vmatprep.subr.bf16.mxu1 %v3039_v51  ;;  %v1466_v8 = vunpack.c.0.s8 %v1465_v39  ;;  %v2645_v39 = vld [vmem:[%s3877_s6 + $0x1] ss:$0 sm:$0xff] }
 0x25d   : > { %v1355_v28 = vunpack.c.l.b16 %v1318_v14  ;;  %v1303_v45 = vadd.f32 %v1302_v34, %v1301_v26  ;;  %v1306_v16 = vadd.f32 %v1256_v56, %v1255_v41 }
 0x25e   : > { %v3608_v20 = vsub.s32 %v1466_v8, %v3536_v42 }
 0x25f   : > { %v1367_v2 = vsel %vm1366_vm7, %v1355_v28, %v1365_v6  ;;  %v1304_v30 = vrot.slane %v1303_v45, 1  ;;  %v1307_v50 = vrot.slane %v1306_v16, 4  ;;  %2870 = vmatpush3.bf16.msra.mxu1 %v3039_v51  ;;  %v3041_v6 = vld [vmem:[%s3876_s5 + $0x78] sm:$0xff]  }
 0x260   : > { %2871 = vmatprep.subr.bf16.mxu1 %v3040_v18 }
 0x261   : > { %v1305_v4 = vadd.f32 %v1304_v30, %v1303_v45  ;;  %v1308_v60 = vadd.f32 %v1307_v50, %v1306_v16 }
 0x263   : > { %v1319_v22 = vpack.c.bf16 %v1305_v4, %v1305_v4  ;;  %v1309_v31 = vrot.slane %v1308_v60, 2  ;;  %2872 = vmatpush3.bf16.msra.mxu1 %v3040_v18 }
 0x264   : > { %2873 = vmatprep.subr.bf16.mxu1 %v3041_v6 }
 0x265   : > { %v1356_v32 = vunpack.c.l.b16 %v1319_v22  ;;  %v1310_v10 = vadd.f32 %v1309_v31, %v1308_v60 }
 0x267   : > { %v1369_v33 = vsel %vm1368_vm8, %v1356_v32, %v1367_v2  ;;  %v1311_v37 = vrot.slane %v1310_v10, 1  ;;  %2874 = vmatpush3.bf16.msra.mxu1 %v3041_v6 }
 0x268   : > { %2883 = vmatprep.subr.bf16.mxu1 %v3115_v61 }
 0x269   : > { %v1312_v24 = vadd.f32 %v1311_v37, %v1310_v10 }
 0x26b   : > { %v1320_v12 = vpack.c.bf16 %v1312_v24, %v1312_v24 }
 0x26d   : > { %v1357_v57 = vunpack.c.l.b16 %v1320_v12 }
 0x26f   : > { %v1371_v38 = vsel %vm1370_vm9, %v1357_v57, %v1369_v33 }
 0x270   : > { %v1372_v35 = vpack.c.b16 %v1371_v38, %v1371_v38 }
 0x272   : > { %2856 = vmatmul.mubr.bf16.vlgmr.msra.gmra.mrb[40].mxu0 %v1372_v35 }
 0x273   : > { %2891 = vmatprep.mubr.msk.bf16.mxu0 %vm3116_vm0, %v3115_v61 }
 0x345   : > { %v1456_v26 = vpop.f32.mrb[40].mxu0 }
 0x346   : > { %v1457_v41 = vadd.f32 %v2620_v0, %v1456_v26  ;;  %v2857_v46 = vpop.f32.mrb[41].mxu0 }
 0x347   : > { %v1459_v40 = vpop.f32.mrb[42].mxu0 }
 0x348   : > { %v1463_v14 = vcombine.high %v1457_v41, %v1457_v41  ;;  %v1470_v34 = vrot.slane %v1457_v41, %v3608_v20  ;;  %v2858_v56 = vpop.f32.mrb[43].mxu0 }
 0x349   : > { %v663_v56 = vld [vmem:[%s3429_s28 + $0x10] sm:$0xff] }
 0x34a   : > { %v1477_v47 = vrot.slane %v1463_v14, %v3608_v20  ;;  %v1478_v28 = vcombine.high %v1470_v34, %v1470_v34  ;;  %v1486_v45 = vrot.slane %v1470_v34, %v3608_v20 }
 0x34c   : > { %v1479_v16 = vcombine.high %v1477_v47, %v1477_v47  ;;  %v1493_v2 = vrot.slane %v1477_v47, %v3608_v20  ;;  %v1500_v30 = vrot.slane %v1478_v28, %v3608_v20  ;;  %v1508_v50 = vcombine.high %v1486_v45, %v1486_v45  ;;  %v664_v47 = vld [vmem:[%s3429_s28 + $0x18] sm:$0xff] }
 0x34d   : > { %v1515_v4 = vrot.slane %v1486_v45, %v3539_v43 }
 0x34e   : > { %v1507_v60 = vrot.slane %v1479_v16, %v3608_v20  ;;  %v1510_v22 = vcombine.high %v1500_v30, %v1500_v30  ;;  %v1523_v31 = vrot.slane %v1508_v50, %v3539_v43  ;;  %v1519_v32 = vrot.slane %v1500_v30, %v3539_v43  ;;  %v668_v30 = vld [vmem:[%s3429_s28 + $0x38] sm:$0xff] }
 0x34f   : > { %v1531_v10 = vrot.slane %v1493_v2, %v3539_v43  ;;  %v1509_v12 = vcombine.high %v1493_v2, %v1493_v2  ;;  %v3623_v57 = vadd.f32 %v1515_v4, %v3326_v48  ;;  %v667_v2 = vld [vmem:[%s3429_s28 + $0x30] sm:$0xff] }
 0x350   : > { %v1527_v33 = vrot.slane %v1510_v22, %v3539_v43  ;;  %v1535_v37 = vrot.slane %v1507_v60, %v3539_v43  ;;  %v1511_v24 = vcombine.high %v1507_v60, %v1507_v60  ;;  %v3626_v38 = vadd.f32 %v1519_v32, %v3328_v49 }
 0x351   : > { %v3629_v35 = vadd.f32 %v1523_v31, %v3332_v52  ;;  %v3635_v51 = vadd.f32 %v1531_v10, %v3336_v54  ;;  %v1707_v31 = vpack.c.bf16 %v664_v47, %v663_v56 }
 0x352   : > { %v3632_v36 = vadd.f32 %v1527_v33, %v3334_v53  ;;  %v3638_v18 = vadd.f32 %v1535_v37, %v3338_v55  ;;  %v1560_v6 = vpack.c.bf16 %v3626_v38, %v3623_v57  ;;  %v1543_v52 = vrot.slane %v1511_v24, %v3539_v43 }
 0x353   : > { %v1539_v53 = vrot.slane %v1509_v12, %v3539_v43  ;;  %v1708_v12 = vpack.c.bf16 %v668_v30, %v667_v2  ;;  %v683_v2 = vld [vmem:[%s3429_s28 + $0xb0] sm:$0xff]  ;;  %v684_v30 = vld [vmem:[%s3429_s28 + $0xb8] sm:$0xff] }
 0x354   : > { %v1561_v48 = vpack.c.bf16 %v3632_v36, %v3629_v35  ;;  %v1562_v49 = vpack.c.bf16 %v3638_v18, %v3635_v51  ;;  %2875 = vmatprep.mubr.bf16.mxu1 %v1560_v6  ;;  %v3649_v54 = vadd.f32 %v1543_v52, %v3346_v59 }
 0x355   : > { %v3652_v55 = vadd.f32 %v1539_v53, %v3344_v58  ;;  %v671_v53 = vld [vmem:[%s3429_s28 + $0x50] sm:$0xff] }
 0x356   : > { %2876 = vmatmul.mubr.bf16.vlgmr.msra.gmra.mrb[32].mxu1 %v1561_v48 }
 0x357   : > { %2879 = vmatprep.mubr.bf16.mxu1 %v1562_v49  ;;  %v1563_v62 = vpack.c.bf16 %v3649_v54, %v3652_v55 }
 0x35e   : > { %2880 = vmatmul.mubr.bf16.gmra.mrb[36].mxu1 %v1563_v62  ;;  %v672_v62 = vld [vmem:[%s3429_s28 + $0x58] sm:$0xff] }
 0x35f   : > { %2885 = vmatprep.mubr.msk.bf16.mxu1 %vm3116_vm0, %v3115_v61 }
 0x429   : > { %v2877_v8 = vpop.f32.mrb[32].mxu1 }
 0x42a   : > { %v1677_v59 = vadd.f32 %v2877_v8, %v2645_v39  ;;  %v1668_v0 = vpop.f32.mrb[33].mxu1 }
 0x42b   : > { %v1669_v26 = vadd.f32 %v2645_v39, %v1668_v0  ;;  %v2878_v58 = vpop.f32.mrb[34].mxu1  ;;  %v675_v0 = vld [vmem:[%s3429_s28 + $0x70] sm:$0xff] }
 0x42c   : > { %v1680_v41 = vadd.f32 %v2878_v58, %v2645_v39  ;;  %v1671_v46 = vpop.f32.mrb[35].mxu1  ;;  %v1701_v40 = vmax.f32 %v1677_v59, 0.0 }
 0x42d   : > { %v1699_v14 = vmax.f32 %v1669_v26, 0.0  ;;  %v1672_v34 = vadd.f32 %v2645_v39, %v1671_v46  ;;  %v676_v26 = vld [vmem:[%s3429_s28 + $0x78] sm:$0xff]  ;;  %v1709_v46 = vpack.c.bf16 %v672_v62, %v671_v53  ;;  %v3046_v62 = vld [vmem:[%s3878_s7 + $0x60] sm:$0xff]  }
 0x42e   : > { %v1702_v45 = vmax.f32 %v1680_v41, 0.0  ;;  %v1717_v50 = vpack.c.bf16 %v1701_v40, %v1701_v40  ;;  %v3045_v53 = vld [vmem:[%s3878_s7 + $0x58] sm:$0xff]  }
 0x42f   : > { %v1715_v28 = vpack.c.bf16 %v1699_v14, %v1699_v14  ;;  %v1700_v16 = vmax.f32 %v1672_v34, 0.0  ;;  %v1710_v34 = vpack.c.bf16 %v676_v26, %v675_v0  ;;  %v3049_v0 = vld [vmem:[%s3878_s7 + $0x78] sm:$0xff]   ;;  %v432_v26 = vsub.s32 1, %v3536_v42 }
 0x430   : > { %v1718_v10 = vpack.c.bf16 %v1702_v45, %v1702_v45  ;;  %v1821_v52 = vsel %vm867_vm1, %v1717_v50, 0  ;;  %v680_v45 = vld [vmem:[%s3429_s28 + $0x98] sm:$0xff] }
 0x431   : > { %v1716_v4 = vpack.c.bf16 %v1700_v16, %v1700_v16  ;;  %v2881_v60 = vpop.f32.mrb[36].mxu1  ;;  %v1727_v22 = vsel %vm867_vm1, %v1715_v28, 0  ;;  %v679_v28 = vld [vmem:[%s3429_s28 + $0x90] sm:$0xff] }
 0x432   : > { %v1684_v32 = vpop.f32.mrb[37].mxu1  ;;  %2884 = vmatpush3.bf16.msra.mxu1 %v1727_v22  ;;  %v1868_v59 = vsel %vm867_vm1, %v1718_v10, 0  ;;  %v1693_v58 = vadd.f32 %v2881_v60, %v2645_v39  ;;  %v1712_v22 = vpack.c.bf16 %v684_v30, %v683_v2  ;;  %v688_v10 = vld [vmem:[%s3429_s28 + $0xd8] sm:$0xff] }
 0x433   : > { %v1685_v33 = vadd.f32 %v2645_v39, %v1684_v32  ;;  %v2882_v37 = vpop.f32.mrb[38].mxu1  ;;  %v1774_v24 = vsel %vm867_vm1, %v1716_v4, 0  ;;  %2895 = vmatprep.subr.bf16.mxu1 %v3115_v61  ;;  %v1711_v4 = vpack.c.bf16 %v680_v45, %v679_v28  ;;  %v687_v32 = vld [vmem:[%s3429_s28 + $0xd0] sm:$0xff] }
 0x434   : > { %v1687_v6 = vpop.f32.mrb[39].mxu1  ;;  %2890 = vmatpush3.bf16.msra.mxu0 %v1774_v24  ;;  %v1696_v40 = vadd.f32 %v2882_v37, %v2645_v39  ;;  %v1705_v56 = vmax.f32 %v1693_v58, 0.0  ;;  %v691_v37 = vld [vmem:[%s3429_s28 + $0xf0] sm:$0xff]  ;;  %v692_v24 = vld [vmem:[%s3429_s28 + $0xf8] sm:$0xff]  ;;  %v3747_v58 = vrot.slane %v3544_v44, %v432_v26  ;;  %s3054_s28 = sshll.u32 %s3118_s26, 4  ;;  %s3055_s28 = int_to_ptr.vmem [resolvable:$false] %s3054_s28 }
 0x435   : > { %v1703_v48 = vmax.f32 %v1685_v33, 0.0  ;;  %v1688_v49 = vadd.f32 %v2645_v39, %v1687_v6  ;;  %2886 = vmatmul.mubr.msk.bf16.vlgmr.msra.gmra.mrb[40].mxu1 %vm863_vm2, %v1707_v31  ;;  %2901 = vmatprep.subr.bf16.mxu0 %v3115_v61  ;;  %v1714_v6 = vpack.c.bf16 %v692_v24, %v691_v37  ;;  %s3056_s23 = scalar_lea.vmem %s3055_s28, 256  ;;  %p3057_p0 = scmp.lt.s32.totalorder %s3828_s17, %s3055_s28 }
 0x436   : > { %2896 = vmatpush3.bf16.msra.mxu1 %v1821_v52  ;;  %2897 = vmatprep.mubr.msk.bf16.mxu1 %vm3116_vm0, %v3115_v61  ;;  %v1706_v16 = vmax.f32 %v1696_v40, 0.0  ;;  %v1721_v50 = vpack.c.bf16 %v1705_v56, %v1705_v56  ;;  %v3044_v52 = vld [vmem:[%s3878_s7 + $0x50] sm:$0xff]   ;;  %v563_v40 = vadd.f32 %v3366_v3, %v3747_v58  ;;  %v577_v3 = vadd.f32 %v3378_v9, %v3747_v58  ;;  %p3058_p1 = scmp.lt.s32.totalorder %s3056_s23, %s3050_s25 }
 0x437   : > { %v1704_v8 = vmax.f32 %v1688_v49, 0.0  ;;  %2892 = vmatmul.mubr.msk.bf16.vlgmr.msra.gmra.mrb[44].mxu0 %vm863_vm2, %v1708_v12  ;;  %2907 = vmatprep.subr.bf16.mxu1 %v3115_v61  ;;  %v1719_v41 = vpack.c.bf16 %v1703_v48, %v1703_v48  ;;  %v1713_v12 = vpack.c.bf16 %v688_v10, %v687_v32  ;;  %v3042_v48 = vld [vmem:[%s3878_s7 + $0x40] sm:$0xff]   ;;  %v3043_v49 = vld [vmem:[%s3878_s7 + $0x48] sm:$0xff]  }
 0x438   : > { %2902 = vmatpush3.bf16.msra.mxu0 %v1868_v59  ;;  %2903 = vmatprep.mubr.msk.bf16.mxu0 %vm3116_vm0, %v3115_v61  ;;  %v1722_v60 = vpack.c.bf16 %v1706_v16, %v1706_v16  ;;  %v2009_v31 = vsel %vm867_vm1, %v1721_v50, 0  ;;  %v3048_v59 = vld [vmem:[%s3878_s7 + $0x70] sm:$0xff]   ;;  %p3059_p2 = por %p3058_p1, %p3057_p0 }
 0x439   : > { %2913 = vmatprep.subr.bf16.mxu0 %v3115_v61  ;;  %v1720_v14 = vpack.c.bf16 %v1704_v8, %v1704_v8  ;;  %v1915_v47 = vsel %vm867_vm1, %v1719_v41, 0  ;;  %v3047_v8 = vld [vmem:[%s3878_s7 + $0x68] sm:$0xff]   ;;  %v553_v41 = vadd.f32 %v3358_v63, %v3747_v58  ;;  %v573_v63 = vadd.f32 %v3374_v7, %v3747_v58 }
 0x43a   : > { %v2056_v33 = vsel %vm867_vm1, %v1722_v60, 0  ;;  %p3060_p3 = pnand %p3059_p2, %p3053_p13 }
 0x43b   : > { %v1962_v39 = vsel %vm867_vm1, %v1720_v14, 0  ;;  %v567_v14 = vadd.f32 %v3370_v5, %v3747_v58  ;;  %v583_v5 = vadd.f32 %v3382_v11, %v3747_v58  ;;  %v638_v32 = vmax.f32 %v573_v63, 0.0 }
 0x43d   : > { %2898 = vmatmul.mubr.msk.bf16.vlgmr.msra.gmra.mrb[44].mxu1 %vm863_vm2, %v1709_v46  ;;  %v557_v46 = vadd.f32 %v3362_v1, %v3747_v58  ;;  %v636_v16 = vmax.f32 %v567_v14, 0.0  ;;  %v642_v24 = vmax.f32 %v583_v5, 0.0 }
 0x43e   : > { %2908 = vmatpush3.bf16.msra.mxu1 %v1915_v47  ;;  %2909 = vmatprep.mubr.msk.bf16.mxu1 %vm3116_vm0, %v3115_v61  ;;  %v634_v47 = vmax.f32 %v563_v40, 0.0 }
 0x43f   : > { %2904 = vmatmul.mubr.msk.bf16.vlgmr.msra.gmra.mrb[48].mxu0 %vm863_vm2, %v1710_v34  ;;  %2919 = vmatprep.subr.bf16.mxu1 %v3115_v61  ;;  %v632_v56 = vmax.f32 %v557_v46, 0.0 }
 0x440   : > { %2914 = vmatpush3.bf16.msra.mxu0 %v1962_v39  ;;  %2915 = vmatprep.mubr.msk.bf16.mxu0 %vm3116_vm0, %v3115_v61 }
 0x441   : > { %2925 = vmatprep.subr.bf16.mxu0 %v3115_v61 }
 0x445   : > { %2910 = vmatmul.mubr.msk.bf16.vlgmr.msra.gmra.mrb[48].mxu1 %vm863_vm2, %v1711_v4 }
 0x446   : > { %2920 = vmatpush3.bf16.msra.mxu1 %v2009_v31  ;;  %2921 = vmatprep.mubr.msk.bf16.mxu1 %vm3116_vm0, %v3115_v61  ;;  %v587_v31 = vadd.f32 %v3386_v13, %v3747_v58  ;;  %v593_v13 = vadd.f32 %v3390_v15, %v3747_v58 }
 0x447   : > { %2916 = vmatmul.mubr.msk.bf16.vlgmr.msra.gmra.mrb[52].mxu0 %vm863_vm2, %v1712_v22  ;;  %2931 = vmatprep.subr.bf16.mxu1 %v3115_v61 }
 0x448   : > { %2926 = vmatpush3.bf16.msra.mxu0 %v2056_v33  ;;  %2927 = vmatprep.mubr.msk.bf16.mxu0 %vm3116_vm0, %v3115_v61  ;;  %v640_v33 = vmax.f32 %v577_v3, 0.0  ;;  %v646_v15 = vmax.f32 %v593_v13, 0.0 }
 0x44d   : > { %2922 = vmatmul.mubr.msk.bf16.vlgmr.msra.gmra.mrb[52].mxu1 %vm863_vm2, %v1713_v12 }
 0x44e   : > { %2947 = vmatprep.mubr.msk.bf16.mxu1 %vm3116_vm0, %v3115_v61  ;;  %2932 = vmatpush3.bf16.msra.mxu1 %v3042_v48 }
 0x44f   : > { %2928 = vmatmul.mubr.msk.bf16.vlgmr.msra.gmra.mrb[56].mxu0 %vm863_vm2, %v1714_v6  ;;  %2933 = vmatprep.subr.bf16.mxu1 %v3115_v61 }
 0x452   : > { %2934 = vmatpush3.bf16.msra.mxu1 %v3043_v49  ;;  %v644_v49 = vmax.f32 %v587_v31, 0.0 }
 0x453   : > { %2935 = vmatprep.subr.bf16.mxu1 %v3115_v61 }
 0x456   : > { %2936 = vmatpush3.bf16.msra.mxu1 %v3044_v52 }
 0x457   : > { %2937 = vmatprep.subr.bf16.mxu1 %v3115_v61 }
 0x45a   : > { %2938 = vmatpush3.bf16.msra.mxu1 %v3045_v53 }
 0x45b   : > { %2939 = vmatprep.subr.bf16.mxu1 %v3115_v61 }
 0x45e   : > { %2940 = vmatpush3.bf16.msra.mxu1 %v3046_v62 }
 0x45f   : > { %2941 = vmatprep.subr.bf16.mxu1 %v3115_v61 }
 0x462   : > { %2942 = vmatpush3.bf16.msra.mxu1 %v3047_v8 }
 0x463   : > { %2943 = vmatprep.subr.bf16.mxu1 %v3115_v61 }
 0x466   : > { %2944 = vmatpush3.bf16.msra.mxu1 %v3048_v59 }
 0x467   : > { %2945 = vmatprep.subr.bf16.mxu1 %v3115_v61  ;;  %v630_v61 = vmax.f32 %v553_v41, 0.0  ;;  %v597_v41 = vadd.f32 %v3394_v17, %v3747_v58 }
 0x469   : > { %v648_v63 = vmax.f32 %v597_v41, 0.0 }
 0x46a   : > { %2946 = vmatpush3.bf16.msra.mxu1 %v3049_v0 }
 0x508   : > { %v1763_v34 = vpop.f32.mrb[40].mxu1 }
 0x509   : > { %v2099_v42 = vmul.f32 %v1763_v34, %v630_v61  ;;  %v2887_v28 = vpop.f32.mrb[41].mxu1 }
 0x50a   : > { %v1766_v44 = vpop.f32.mrb[42].mxu1  ;;  %v1810_v45 = vpop.f32.mrb[44].mxu0 }
 0x50b   : > { %v2100_v39 = vmul.f32 %v1766_v44, %v632_v56  ;;  %v2101_v1 = vmul.f32 %v1810_v45, %v634_v47  ;;  %v2893_v2 = vpop.f32.mrb[45].mxu0  ;;  %v2888_v30 = vpop.f32.mrb[43].mxu1  ;;  %v603_v47 = vadd.f32 %v3398_v19, %v3747_v58  ;;  %v613_v19 = vadd.f32 %v3406_v23, %v3747_v58 }
 0x50c   : > { %v1813_v50 = vpop.f32.mrb[46].mxu0 }
 0x50d   : > { %v2115_v4 = vadd.f32 %v2100_v39, %v2099_v42  ;;  %v2102_v60 = vmul.f32 %v1813_v50, %v636_v16  ;;  %v2894_v22 = vpop.f32.mrb[47].mxu0  ;;  %v607_v42 = vadd.f32 %v3402_v21, %v3747_v58  ;;  %v650_v50 = vmax.f32 %v603_v47, 0.0 }
 0x50f   : > { %v2116_v10 = vrot.slane %v2115_v4, 4  ;;  %v2122_v7 = vadd.f32 %v2102_v60, %v2101_v1  ;;  %v652_v5 = vmax.f32 %v607_v42, 0.0 }
 0x510   : > { %v1857_v37 = vpop.f32.mrb[44].mxu1 }
 0x511   : > { %v2117_v12 = vadd.f32 %v2116_v10, %v2115_v4  ;;  %v2123_v6 = vrot.slane %v2122_v7, 4  ;;  %v2103_v48 = vmul.f32 %v1857_v37, %v638_v32  ;;  %v2899_v9 = vpop.f32.mrb[45].mxu1  ;;  %v617_v37 = vadd.f32 %v3410_v25, %v3747_v58 }
 0x512   : > { %v1860_v52 = vpop.f32.mrb[46].mxu1  ;;  %v1904_v53 = vpop.f32.mrb[48].mxu0 }
 0x513   : > { %v2118_v11 = vrot.slane %v2117_v12, 2  ;;  %v2124_v62 = vadd.f32 %v2123_v6, %v2122_v7  ;;  %v2104_v8 = vmul.f32 %v1860_v52, %v640_v33  ;;  %v2105_v59 = vmul.f32 %v1904_v53, %v642_v24  ;;  %v2905_v0 = vpop.f32.mrb[49].mxu0  ;;  %v2900_v26 = vpop.f32.mrb[47].mxu1 }
 0x514   : > { %v1907_v46 = vpop.f32.mrb[50].mxu0  ;;  %v623_v24 = vadd.f32 %v3414_v27, %v3747_v58  ;;  %v654_v53 = vmax.f32 %v613_v19, 0.0  ;;  %v656_v13 = vmax.f32 %v617_v37, 0.0 }
 0x515   : > { %v2119_v40 = vadd.f32 %v2118_v11, %v2117_v12  ;;  %v2125_v61 = vrot.slane %v2124_v62, 2  ;;  %v2129_v14 = vadd.f32 %v2104_v8, %v2103_v48  ;;  %v2106_v34 = vmul.f32 %v1907_v46, %v644_v49  ;;  %v2906_v56 = vpop.f32.mrb[51].mxu0 }
 0x516   : > { %v627_v11 = vadd.f32 %v3418_v29, %v3747_v58  ;;  %v658_v41 = vmax.f32 %v623_v24, 0.0 }
 0x517   : > { %v2120_v28 = vrot.slane %v2119_v40, 1  ;;  %v2126_v44 = vadd.f32 %v2125_v61, %v2124_v62  ;;  %v2130_v45 = vrot.slane %v2129_v14, 4  ;;  %v2136_v16 = vadd.f32 %v2106_v34, %v2105_v59 }
 0x518   : > { %v1951_v39 = vpop.f32.mrb[48].mxu1  ;;  %v660_v42 = vmax.f32 %v627_v11, 0.0 }
 0x519   : > { %v2121_v17 = vadd.f32 %v2120_v28, %v2119_v40  ;;  %v2127_v1 = vrot.slane %v2126_v44, 1  ;;  %v2131_v2 = vadd.f32 %v2130_v45, %v2129_v14  ;;  %v2137_v30 = vrot.slane %v2136_v16, 4  ;;  %v2911_v3 = vpop.f32.mrb[49].mxu1 }
 0x51a   : > { %v2107_v4 = vmul.f32 %v1951_v39, %v646_v15  ;;  %v1954_v60 = vpop.f32.mrb[50].mxu1  ;;  %v1998_v21 = vpop.f32.mrb[52].mxu0 }
 0x51b   : > { %v2171_v22 = vpack.c.bf16 %v2121_v17, %v2121_v17  ;;  %v2128_v31 = vadd.f32 %v2127_v1, %v2126_v44  ;;  %v2132_v32 = vrot.slane %v2131_v2, 2  ;;  %v2138_v10 = vadd.f32 %v2137_v30, %v2136_v16  ;;  %v2917_v7 = vpop.f32.mrb[53].mxu0  ;;  %v2912_v33 = vpop.f32.mrb[51].mxu1 }
 0x51c   : > { %v2108_v12 = vmul.f32 %v1954_v60, %v648_v63  ;;  %v2109_v6 = vmul.f32 %v1998_v21, %v650_v50  ;;  %v2001_v48 = vpop.f32.mrb[54].mxu0 }
 0x51d   : > { %v2172_v9 = vpack.c.bf16 %v2128_v31, %v2128_v31  ;;  %v2133_v23 = vadd.f32 %v2132_v32, %v2131_v2  ;;  %v2139_v49 = vrot.slane %v2138_v10, 2  ;;  %v2918_v52 = vpop.f32.mrb[55].mxu0  ;;  %v2110_v8 = vmul.f32 %v2001_v48, %v652_v5 }
 0x51e   : > { %v2143_v62 = vadd.f32 %v2108_v12, %v2107_v4  ;;  %v2209_v59 = vunpack.c.l.b16 %v2171_v22 }
 0x51f   : > { %v2210_v0 = vunpack.c.l.b16 %v2172_v9  ;;  %v2134_v26 = vrot.slane %v2133_v23, 1  ;;  %v2140_v25 = vadd.f32 %v2139_v49, %v2138_v10  ;;  %v2150_v46 = vadd.f32 %v2110_v8, %v2109_v6 }
 0x520   : > { %v2144_v27 = vrot.slane %v2143_v62, 4  ;;  %v2045_v40 = vpop.f32.mrb[52].mxu1 }
 0x521   : > { %v2217_v61 = vsel %vm1358_vm3, %v2210_v0, %v2209_v59  ;;  %v2135_v14 = vadd.f32 %v2134_v26, %v2133_v23  ;;  %v2141_v34 = vrot.slane %v2140_v25, 1  ;;  %v2111_v56 = vmul.f32 %v2045_v40, %v654_v53  ;;  %v2923_v47 = vpop.f32.mrb[53].mxu1 }
 0x522   : > { %v2145_v28 = vadd.f32 %v2144_v27, %v2143_v62  ;;  %v2151_v29 = vrot.slane %v2150_v46, 4  ;;  %v2048_v58 = vpop.f32.mrb[54].mxu1  ;;  %v2092_v44 = vpop.f32.mrb[56].mxu0 }
 0x523   : > { %v2173_v45 = vpack.c.bf16 %v2135_v14, %v2135_v14  ;;  %v2142_v16 = vadd.f32 %v2141_v34, %v2140_v25  ;;  %v2112_v15 = vmul.f32 %v2048_v58, %v656_v13  ;;  %v2113_v63 = vmul.f32 %v2092_v44, %v658_v41  ;;  %v2929_v39 = vpop.f32.mrb[57].mxu0  ;;  %v2924_v17 = vpop.f32.mrb[55].mxu1 }
 0x524   : > { %v2146_v1 = vrot.slane %v2145_v28, 2  ;;  %v2152_v2 = vadd.f32 %v2151_v29, %v2150_v46  ;;  %v2095_v30 = vpop.f32.mrb[58].mxu0 }
 0x525   : > { %v2211_v3 = vunpack.c.l.b16 %v2173_v45  ;;  %v2174_v50 = vpack.c.bf16 %v2142_v16, %v2142_v16  ;;  %v2157_v5 = vadd.f32 %v2112_v15, %v2111_v56  ;;  %v2114_v19 = vmul.f32 %v2095_v30, %v660_v42  ;;  %v2930_v4 = vpop.f32.mrb[59].mxu0 }
 0x526   : > { %v2147_v60 = vadd.f32 %v2146_v1, %v2145_v28  ;;  %v2153_v21 = vrot.slane %v2152_v2, 2  ;;  %v2678_v28 = vld [vmem:[%s3879_s8 + $0x1] ss:$0 sm:$0xff] }
 0x527   : > { %v2218_v22 = vsel %vm1360_vm4, %v2211_v3, %v2217_v61  ;;  %v2212_v31 = vunpack.c.l.b16 %v2174_v50  ;;  %v2158_v32 = vrot.slane %v2157_v5, 4  ;;  %v2164_v10 = vadd.f32 %v2114_v19, %v2113_v63 }
 0x528   : > { %v2148_v7 = vrot.slane %v2147_v60, 1  ;;  %v2154_v33 = vadd.f32 %v2153_v21, %v2152_v2 }
 0x529   : > { %v2219_v37 = vsel %vm1362_vm5, %v2212_v31, %v2218_v22  ;;  %v2159_v24 = vadd.f32 %v2158_v32, %v2157_v5  ;;  %v2165_v12 = vrot.slane %v2164_v10, 4 }
 0x52a   : > { %v2149_v6 = vadd.f32 %v2148_v7, %v2147_v60  ;;  %v2155_v48 = vrot.slane %v2154_v33, 1 }
 0x52b   : > { %v2160_v9 = vrot.slane %v2159_v24, 2  ;;  %v2166_v23 = vadd.f32 %v2165_v12, %v2164_v10 }
 0x52c   : > { %v2175_v49 = vpack.c.bf16 %v2149_v6, %v2149_v6  ;;  %v2156_v52 = vadd.f32 %v2155_v48, %v2154_v33 }
 0x52d   : > { %v2161_v53 = vadd.f32 %v2160_v9, %v2159_v24  ;;  %v2167_v11 = vrot.slane %v2166_v23, 2 }
 0x52e   : > { %v2213_v62 = vunpack.c.l.b16 %v2175_v49  ;;  %v2176_v8 = vpack.c.bf16 %v2156_v52, %v2156_v52 }
 0x52f   : > { %v2162_v59 = vrot.slane %v2161_v53, 1  ;;  %v2168_v0 = vadd.f32 %v2167_v11, %v2166_v23 }
 0x530   : > { %v2220_v26 = vsel %vm1364_vm6, %v2213_v62, %v2219_v37  ;;  %v2214_v25 = vunpack.c.l.b16 %v2176_v8 }
 0x531   : > { %v2163_v13 = vadd.f32 %v2162_v59, %v2161_v53  ;;  %v2169_v41 = vrot.slane %v2168_v0, 1 }
 0x532   : > { %v2221_v27 = vsel %vm1366_vm7, %v2214_v25, %v2220_v26 }
 0x533   : > { %v2177_v46 = vpack.c.bf16 %v2163_v13, %v2163_v13  ;;  %v2170_v40 = vadd.f32 %v2169_v41, %v2168_v0 }
 0x535   : > { %v2215_v61 = vunpack.c.l.b16 %v2177_v46  ;;  %v2178_v14 = vpack.c.bf16 %v2170_v40, %v2170_v40 }
 0x537   : > { %v2216_v34 = vunpack.c.l.b16 %v2178_v14  ;;  %v2222_v56 = vsel %vm1368_vm8, %v2215_v61, %v2221_v27 }
 0x539   : > { %v2223_v47 = vsel %vm1370_vm9, %v2216_v34, %v2222_v56 }
 0x53a   : > { %v2224_v42 = vpack.c.b16 %v2223_v47, %v2223_v47 }
 0x53c   : > { %2948 = vmatmul.mubr.bf16.vlgmr.msra.gmra.mrb[56].mxu1 %v2224_v42 }
 0x60f   : > { %v2308_v29 = vpop.f32.mrb[56].mxu1 }
 0x610   : > { %v2309_v58 = vadd.f32 %v2678_v28, %v2308_v29  ;;  %v2949_v44 = vpop.f32.mrb[57].mxu1 }
 0x611   : > { %v2311_v45 = vpop.f32.mrb[58].mxu1 }
 0x612   : > { %v2315_v16 = vcombine.high %v2309_v58, %v2309_v58  ;;  %v2322_v15 = vrot.slane %v2309_v58, %v3608_v20  ;;  %v2950_v63 = vpop.f32.mrb[59].mxu1 }
 0x614   : > { %v2329_v39 = vrot.slane %v2315_v16, %v3608_v20  ;;  %v2330_v17 = vcombine.high %v2322_v15, %v2322_v15  ;;  %v2338_v1 = vrot.slane %v2322_v15, %v3608_v20 }
 0x616   : > { %v2331_v2 = vcombine.high %v2329_v39, %v2329_v39  ;;  %v2345_v30 = vrot.slane %v2329_v39, %v3608_v20  ;;  %v2352_v3 = vrot.slane %v2330_v17, %v3608_v20  ;;  %v2360_v50 = vcombine.high %v2338_v1, %v2338_v1 }
 0x617   : > { %v2367_v5 = vrot.slane %v2338_v1, %v3539_v43 }
 0x618   : > { %v2359_v19 = vrot.slane %v2331_v2, %v3608_v20  ;;  %v2361_v4 = vcombine.high %v2345_v30, %v2345_v30  ;;  %v2362_v60 = vcombine.high %v2352_v3, %v2352_v3  ;;  %v2371_v21 = vrot.slane %v2352_v3, %v3539_v43 }
 0x619   : > { %v2375_v22 = vrot.slane %v2360_v50, %v3539_v43  ;;  %v2383_v31 = vrot.slane %v2345_v30, %v3539_v43  ;;  %v2404_v32 = vadd.f32 %v2367_v5, %v3623_v57 }
 0x61a   : > { %v2363_v10 = vcombine.high %v2359_v19, %v2359_v19  ;;  %v2379_v7 = vrot.slane %v2362_v60, %v3539_v43  ;;  %v2387_v33 = vrot.slane %v2359_v19, %v3539_v43  ;;  %v2391_v37 = vrot.slane %v2361_v4, %v3539_v43 }
 0x61b   : > { %v2405_v24 = vadd.f32 %v2371_v21, %v3626_v38  ;;  %v2406_v20 = vadd.f32 %v2375_v22, %v3629_v35  ;;  %v2408_v12 = vadd.f32 %v2383_v31, %v3635_v51  ;;  %v2412_v6 = vrot.slane %v2404_v32, 4 }
 0x61c   : > { %v2395_v48 = vrot.slane %v2363_v10, %v3539_v43  ;;  %v2407_v9 = vadd.f32 %v2379_v7, %v3632_v36  ;;  %v2409_v57 = vadd.f32 %v2387_v33, %v3638_v18  ;;  %v2410_v23 = vadd.f32 %v2391_v37, %v3652_v55 }
 0x61d   : > { %v2413_v49 = vadd.f32 %v2412_v6, %v2404_v32  ;;  %v2418_v52 = vrot.slane %v2405_v24, 4  ;;  %v2424_v53 = vrot.slane %v2406_v20, 4  ;;  %v2436_v11 = vrot.slane %v2408_v12, 4 }
 0x61e   : > { %v2411_v62 = vadd.f32 %v2395_v48, %v3649_v54  ;;  %v2430_v38 = vrot.slane %v2407_v9, 4  ;;  %v2442_v8 = vrot.slane %v2409_v57, 4  ;;  %v2448_v35 = vrot.slane %v2410_v23, 4 }
 0x61f   : > { %v2414_v51 = vrot.slane %v2413_v49, 2  ;;  %v2419_v59 = vadd.f32 %v2418_v52, %v2405_v24  ;;  %v2425_v0 = vadd.f32 %v2424_v53, %v2406_v20  ;;  %v2437_v43 = vadd.f32 %v2436_v11, %v2408_v12 }
 0x620   : > { %v2431_v26 = vadd.f32 %v2430_v38, %v2407_v9  ;;  %v2443_v36 = vadd.f32 %v2442_v8, %v2409_v57  ;;  %v2449_v25 = vadd.f32 %v2448_v35, %v2410_v23  ;;  %v2454_v18 = vrot.slane %v2411_v62, 4 }
 0x621   : > { %v2415_v13 = vadd.f32 %v2414_v51, %v2413_v49  ;;  %v2420_v55 = vrot.slane %v2419_v59, 2  ;;  %v2426_v41 = vrot.slane %v2425_v0, 2  ;;  %v2438_v27 = vrot.slane %v2437_v43, 2 }
 0x622   : > { %v2432_v46 = vrot.slane %v2431_v26, 2  ;;  %v2444_v40 = vrot.slane %v2443_v36, 2  ;;  %v2450_v54 = vrot.slane %v2449_v25, 2  ;;  %v2455_v61 = vadd.f32 %v2454_v18, %v2411_v62 }
 0x623   : > { %v2416_v14 = vrot.slane %v2415_v13, 1  ;;  %v2421_v34 = vadd.f32 %v2420_v55, %v2419_v59  ;;  %v2427_v56 = vadd.f32 %v2426_v41, %v2425_v0  ;;  %v2439_v47 = vadd.f32 %v2438_v27, %v2437_v43 }
 0x624   : > { %v2433_v42 = vadd.f32 %v2432_v46, %v2431_v26  ;;  %v2445_v28 = vadd.f32 %v2444_v40, %v2443_v36  ;;  %v2451_v29 = vadd.f32 %v2450_v54, %v2449_v25  ;;  %v2456_v58 = vrot.slane %v2455_v61, 2 }
 0x625   : > { %v2422_v44 = vrot.slane %v2421_v34, 1  ;;  %v2428_v45 = vrot.slane %v2427_v56, 1  ;;  %v2440_v15 = vrot.slane %v2439_v47, 1  ;;  %v2417_v39 = vadd.f32 %v2416_v14, %v2415_v13 }
 0x626   : > { %v2434_v16 = vrot.slane %v2433_v42, 1  ;;  %v2457_v63 = vadd.f32 %v2456_v58, %v2455_v61  ;;  %v2446_v2 = vrot.slane %v2445_v28, 1  ;;  %v2452_v3 = vrot.slane %v2451_v29, 1 }
 0x627   : > { %v2423_v17 = vadd.f32 %v2422_v44, %v2421_v34  ;;  %v2429_v1 = vadd.f32 %v2428_v45, %v2427_v56  ;;  %v2441_v19 = vadd.f32 %v2440_v15, %v2439_v47 }
 0x628   : > { %v2435_v30 = vadd.f32 %v2434_v16, %v2433_v42  ;;  %v2458_v50 = vrot.slane %v2457_v63, 1  ;;  %v2447_v60 = vadd.f32 %v2446_v2, %v2445_v28  ;;  %v2453_v22 = vadd.f32 %v2452_v3, %v2451_v29 }
 0x629   : > { %v2468_v5 = vsel %vm1358_vm3, %v2423_v17, %v2417_v39 }
 0x62a   : > { %v2469_v4 = vsel %vm1360_vm4, %v2429_v1, %v2468_v5  ;;  %v2459_v32 = vadd.f32 %v2458_v50, %v2457_v63 }
 0x62b   : > { %v2470_v21 = vsel %vm1362_vm5, %v2435_v30, %v2469_v4 }
 0x62c   : > { %v2471_v31 = vsel %vm1364_vm6, %v2441_v19, %v2470_v21 }
 0x62d   : > { %v2472_v10 = vsel %vm1366_vm7, %v2447_v60, %v2471_v31 }
 0x62e   : > { %v2473_v7 = vsel %vm1368_vm8, %v2453_v22, %v2472_v10 }
 0x62f   : > { %v2474_v33 = vsel %vm1370_vm9, %v2459_v32, %v2473_v7 }
 0x630   : > { %2476 = vst [vmem:[%s362_s16] sm:$0xff] %v2474_v33 }
 0x631   : > { %3063 = shalt.err (!%p3060_p3)
}
 0x632   : > { %s3064_s27 = scalar_lea.hbm %s3826_s14, 128  ;;  %s3068_s16 = scalar_lea.hbm %s3880_s9, 256 }
 0x633   : > { %p3065_p4 = scmp.ne.s32.totalorder %s3826_s14, %s3064_s27  ;;  %p3069_p9 = scmp.lt.u32.totalorder %s3826_s14, %s3880_s9 }
 0x634   : > { %p3070_p10 = scmp.lt.u32.totalorder %s3068_s16, %s3064_s27  ;;  %p3072_p12 = scmp.lt.u32.totalorder %s3064_s27, %s3826_s14 }
 0x635   : > { %p3066_p7 = pnand %p3065_p4, %p3207_p5 }
 0x636   : > { %p3071_p11 = por %p3070_p10, %p3069_p9 }
 0x637   : > { %p3067_p8 = pneg %p3066_p7 }
 0x638   : > { %p3073_p13 = por %p3072_p12, %p3071_p11 }
 0x63a   : > { %p3074_p0 = pnand %p3073_p13, %p3067_p8 }
 0x63c   : > { %3077 = shalt.err (!%p3074_p0)
}
 0x63d   : > { %2951 = dma.vmem_to_hbm [thread:$0]  (%p3207_p5), %s3828_s17, 128, %s3826_s14, %s2478_s13  }
 0x63e PF: > { %p2957_p1 = scmp.ge.s32.totalorder %s3112_s12, 2  ;;  %s2503_s25 = sand.u32 1, %s3100_s30  }
 0x63f   : > { %s2504_s26 = scalar_lea.sflag [#allocation3], %s2503_s25 }
 0x640   : > { %p2954_p2 = pnand %p2957_p1, %p3211_p6 }
 0x642   : > { %3095 = dma.done.wait (!%p2954_p2), %s2504_s26, 128  }
 0x643   : > { %3097 = vsyncadd (!%p2954_p2), %s2504_s26, 4294967168  ;;  %p19_p3 = scmp.ge.s32.totalorder %s3194_s15, 4   ;;  %s3883_s30 = smov %s3104_s10 }
 0x644   : > { %s3884_s10 = smov %s3108_s11  ;;  %s3885_s11 = smov %s3205_s18 }
 0x645   : > { %s3886_s12 = smov %s3194_s15  ;;  %21 = sbr.rel (!%p19_p3) target bundleno = 3 (0x3), region = 99 }
 0x64c   :  { %2509 = vsyncpa [#allocation3], 1 }
 0x64d   :  { %2511 = vsyncpa [#allocation3 + $0x1], 1 }

</bundles_post_ra>
